<compile_context>
chip_gen: v7x
topology: tpu7x:2x2x1
jax: 0.10.0
libtpu: 0.0.40
codegen_flags: <defaults>
</compile_context>

<pallas_src>
import jax
import jax.numpy as jnp
from jax.experimental import pallas as pl
from jax.experimental.pallas import tpu as pltpu

# ----------------------------- config (small) --------------------------------
B, S = 2, 8          # batch, seq
D = 32               # d_model
H = 4                # n_heads
DH = D // H          # d_head
D_MLP = 4 * D        # mlp hidden
V = 64               # d_vocab
N_LAYERS = 2
N_CTX = 16
EPS = 1e-5
OUT_W = 128          # lane-dense output slab width (logits padded to 128, value at lane V)
VH_HID = 4 * D       # value-head hidden width (== 128 here)

_VMEM = pl.BlockSpec(memory_space=pltpu.MemorySpace.VMEM)


# ------------------------------ kernel helpers --------------------------------
def _layernorm(x, w, b):
    mu = jnp.mean(x, axis=-1, keepdims=True)
    var = jnp.mean((x - mu) ** 2, axis=-1, keepdims=True)
    return (x - mu) * jax.lax.rsqrt(var + EPS) * w + b


def _dot(a, b):
    # 2-D matmul on the MXU: operands already bf16, f32 accumulation.
    return jax.lax.dot_general(a, b, (((1,), (0,)), ((), ())),
                               preferred_element_type=jnp.float32)


# -------------------------- fused whole-model kernel ---------------------------
def model_kernel(ids_ref,                                      # SMEM (B*S,) int32 (prefetch)
                 w_e_ref, pos_ref, small_ref, b_qkv_ref,
                 w_qkv_ref, w_o_ref, w_in_ref, w_out_ref,
                 head_small_ref, head_w1_ref, head_w2_ref,
                 out_ref, x_scratch):
    b = pl.program_id(0)
    bf16 = jnp.bfloat16

    # ---- embedding gather (token rows) + positional add, fully in-kernel ----
    for i in range(S):                                         # static unroll (S = 8)
        tok = ids_ref[b * S + i]
        x_scratch[pl.ds(i, 1), :] = w_e_ref[pl.ds(tok, 1), :]
    resid = x_scratch[...] + pos_ref[...]                      # (S, D) f32, stays resident

    # Causal mask, hoisted out of the layer loop (heads/batch are separate batch dims).
    row = jax.lax.broadcasted_iota(jnp.int32, (S, S), 0)
    col = jax.lax.broadcasted_iota(jnp.int32, (S, S), 1)
    causal = (row >= col)[None, :, :]                          # (1, S, S)
    scale = jnp.float32(1.0 / (DH ** 0.5))

    # TODO(synk): for realistic D / N_LAYERS, turn this static layer loop into a grid axis
    # ("arbitrary", streamed per-layer weight blocks + vmem_limit_bytes) and lax.fori_loop.
    for l in range(N_LAYERS):
        ln1_w = small_ref[l, 0:1, :D]; ln1_b = small_ref[l, 1:2, :D]
        ln2_w = small_ref[l, 2:3, :D]; ln2_b = small_ref[l, 3:4, :D]
        b_o   = small_ref[l, 4:5, :D]; b_out = small_ref[l, 5:6, :D]
        b_in  = small_ref[l, 6:7, :]

        # ---- attention: heads as a leading batch axis (no lane slicing / concat) ----
        normed = _layernorm(resid, ln1_w, ln1_b).astype(bf16)          # (S, D), cast once
        normed_b = jnp.broadcast_to(normed, (3 * H, S, D))             # (3H, S, D) bf16
        qkv = jnp.einsum('gnd,gdk->gnk', normed_b, w_qkv_ref[l],
                         preferred_element_type=jnp.float32)           # (3H, S, DH) f32
        qkv = (qkv + b_qkv_ref[l]).astype(bf16)                        # hoisted single cast
        q, k, v = qkv[:H], qkv[H:2 * H], qkv[2 * H:]                   # leading-axis slices

        sc = jnp.einsum('hqd,hkd->hqk', q, k,
                        preferred_element_type=jnp.float32) * scale    # (H, S, S) f32
        sc = jnp.where(causal, sc, jnp.float32(-1e30))
        sc = sc - jnp.max(sc, axis=-1, keepdims=True)
        e = jnp.exp(sc)
        p = e * pl.reciprocal(jnp.sum(e, axis=-1, keepdims=True), approx=True)
        z = jnp.einsum('hqk,hkd->hqd', p.astype(bf16), v,
                       preferred_element_type=jnp.float32)             # (H, S, DH) f32
        zo = jnp.einsum('hqd,hdm->hqm', z.astype(bf16), w_o_ref[l],
                        preferred_element_type=jnp.float32)            # (H, S, D) f32
        resid = resid + jnp.sum(zo, axis=0) + b_o                      # W_O summed over heads

        # ---- MLP ----
        normed2 = _layernorm(resid, ln2_w, ln2_b).astype(bf16)
        hid = jax.nn.gelu(_dot(normed2, w_in_ref[l]) + b_in, approximate=True)
        resid = resid + _dot(hid.astype(bf16), w_out_ref[l]) + b_out

    # ---- final LN ("normalized" hook) -> unembed + value head, one lane-dense store ----
    lnf_w = head_small_ref[0:1, :D]; lnf_b = head_small_ref[1:2, :D]
    b_vh1 = head_small_ref[2:3, :];  out_bias = head_small_ref[3:4, :]
    normed_f = _layernorm(resid, lnf_w, lnf_b).astype(bf16)            # cast once
    big = _dot(normed_f, head_w1_ref[...])                             # (S, OUT_W + VH_HID)
    logit_slab = big[:, :OUT_W]                                        # W_U part (zeros >= V)
    vh_hid = jax.nn.relu(big[:, OUT_W:] + b_vh1)                       # (S, VH_HID)
    out_ref[...] = logit_slab + _dot(vh_hid.astype(bf16), head_w2_ref[...]) + out_bias


# --------------------------------- params --------------------------------------
def init_params(key):
    keys = iter(jax.random.split(key, 64))

    def w(shape, scale=0.02):
        return (scale * jax.random.normal(next(keys), shape)).astype(jnp.float32)

    zeros = lambda shape: jnp.zeros(shape, jnp.float32)
    ones = lambda shape: jnp.ones(shape, jnp.float32)

    blocks = []
    for _ in range(N_LAYERS):
        blocks.append(dict(
            ln1_w=ones((1, D)), ln1_b=zeros((1, D)),
            W_Q=w((D, H * DH)), b_Q=zeros((1, H * DH)),
            W_K=w((D, H * DH)), b_K=zeros((1, H * DH)),
            W_V=w((D, H * DH)), b_V=zeros((1, H * DH)),
            W_O=w((H * DH, D)), b_O=zeros((1, D)),
            ln2_w=ones((1, D)), ln2_b=zeros((1, D)),
            W_in=w((D, D_MLP)), b_in=zeros((1, D_MLP)),
            W_out=w((D_MLP, D)), b_out=zeros((1, D)),
        ))
    return dict(
        W_E=w((V, D)), W_pos=w((N_CTX, D)), blocks=blocks,
        lnf_w=ones((1, D)), lnf_b=zeros((1, D)),
        W_U=w((D, V)), b_U=zeros((1, V)),
        vh_W1=w((D, VH_HID)), vh_b1=zeros((1, VH_HID)),
        vh_W2=w((VH_HID, 1)), vh_b2=zeros((1, 1)),
    )


def pack_params(p):
    """Stack per-layer weights per-head, pack small params into slabs, cast MXU weights bf16."""
    bf = lambda a: a.astype(jnp.bfloat16)
    blocks = p["blocks"]

    def split_heads(wm):        # (D, H*DH) -> (H, D, DH)
        return wm.reshape(D, H, DH).transpose(1, 0, 2)

    def split_heads_bias(bias):  # (1, H*DH) -> (H, 1, DH)
        return bias.reshape(H, DH)[:, None, :]

    w_qkv = jnp.stack([jnp.concatenate([split_heads(blk["W_Q"]), split_heads(blk["W_K"]),
                                        split_heads(blk["W_V"])], axis=0)
                       for blk in blocks], 0)                                  # (L, 3H, D, DH)
    b_qkv = jnp.stack([jnp.concatenate([split_heads_bias(blk["b_Q"]), split_heads_bias(blk["b_K"]),
                                        split_heads_bias(blk["b_V"])], axis=0)
                       for blk in blocks], 0)                                  # (L, 3H, 1, DH)
    w_o = jnp.stack([blk["W_O"].reshape(H, DH, D) for blk in blocks], 0)       # (L, H, DH, D)
    w_in = jnp.stack([blk["W_in"] for blk in blocks], 0)                       # (L, D, D_MLP)
    w_out = jnp.stack([blk["W_out"] for blk in blocks], 0)                     # (L, D_MLP, D)

    def pad_row(v, width):
        return jnp.zeros((width,), jnp.float32).at[:v.size].set(v.reshape(-1))

    # Per-layer small-param slab: rows [ln1_w, ln1_b, ln2_w, ln2_b, b_O, b_out, b_in].
    small = jnp.stack([jnp.stack([pad_row(blk["ln1_w"], D_MLP), pad_row(blk["ln1_b"], D_MLP),
                                  pad_row(blk["ln2_w"], D_MLP), pad_row(blk["ln2_b"], D_MLP),
                                  pad_row(blk["b_O"], D_MLP), pad_row(blk["b_out"], D_MLP),
                                  pad_row(blk["b_in"], D_MLP)], 0)
                       for blk in blocks], 0)                                  # (L, 7, D_MLP)

    # Head slabs: lanes [0, V) = unembed, lane V = value head, rest exactly zero (bf16-safe).
    w_logit = jnp.zeros((D, OUT_W), jnp.float32).at[:, :V].set(p["W_U"])
    head_w1 = jnp.concatenate([w_logit, p["vh_W1"]], axis=1)                   # (D, OUT_W + VH_HID)
    head_w2 = jnp.zeros((VH_HID, OUT_W), jnp.float32).at[:, V].set(p["vh_W2"][:, 0])
    out_bias = pad_row(p["b_U"], OUT_W).at[V].set(p["vh_b2"][0, 0])
    head_small = jnp.stack([pad_row(p["lnf_w"], OUT_W), pad_row(p["lnf_b"], OUT_W),
                            pad_row(p["vh_b1"], OUT_W), out_bias], 0)          # (4, OUT_W)

    return dict(
        w_e=p["W_E"], pos=p["W_pos"][:S],
        small=small, b_qkv=b_qkv,
        w_qkv=bf(w_qkv), w_o=bf(w_o), w_in=bf(w_in), w_out=bf(w_out),
        head_small=head_small, head_w1=bf(head_w1), head_w2=bf(head_w2),
    )


# --------------------------------- forward --------------------------------------
@jax.jit
def forward(input_ids, packed):
    ids = input_ids.reshape(B * S).astype(jnp.int32)
    args = (packed["w_e"], packed["pos"], packed["small"], packed["b_qkv"],
            packed["w_qkv"], packed["w_o"], packed["w_in"], packed["w_out"],
            packed["head_small"], packed["head_w1"], packed["head_w2"])

    flops = B * S * (N_LAYERS * (2 * D * 3 * D + 4 * S * D + 2 * D * D + 4 * D * D_MLP)
                     + 2 * D * (OUT_W + VH_HID) + 2 * VH_HID * OUT_W)
    transcendentals = B * S * N_LAYERS * (H * S + D_MLP)
    bytes_accessed = (ids.size * 4 + sum(a.size * a.dtype.itemsize for a in args)
                      + B * S * OUT_W * 4)

    out = pl.pallas_call(
        model_kernel,
        out_shape=jax.ShapeDtypeStruct((B * S, OUT_W), jnp.float32),
        grid_spec=pltpu.PrefetchScalarGridSpec(
            num_scalar_prefetch=1,                 # input_ids -> SMEM, visible to index_maps
            grid=(B,),                             # batch-parallel (2 TCs on v7x)
            in_specs=[_VMEM] * len(args),          # small constant operands: whole-array VMEM
            out_specs=pl.BlockSpec((S, OUT_W), lambda b, ids_ref: (b, 0)),
            scratch_shapes=[pltpu.VMEM((S, D), jnp.float32)],   # embedding-gather staging
        ),
        compiler_params=pltpu.CompilerParams(dimension_semantics=("parallel",)),
        cost_estimate=pl.CostEstimate(flops=flops, transcendentals=transcendentals,
                                      bytes_accessed=bytes_accessed),
    )(ids, *args)

    out = out.reshape(B, S, OUT_W)
    logits = out[..., :V]          # (B, S, V)
    value_est = out[..., V]        # (B, S)  == value_head(normalized).squeeze(-1)
    return logits, value_est


if __name__ == "__main__":
    key = jax.random.PRNGKey(0)
    pkey, ikey = jax.random.split(key)
    params = init_params(pkey)
    packed = pack_params(params)
    input_ids = jax.random.randint(ikey, (B, S), 0, V, dtype=jnp.int32)

    logits, value_est = forward(input_ids, packed)
    jax.block_until_ready((logits, value_est))

    assert logits.shape == (B, S, V), logits.shape
    assert value_est.shape == (B, S), value_est.shape
    assert logits.dtype == jnp.float32 and value_est.dtype == jnp.float32
    assert bool(jnp.all(jnp.isfinite(logits))) and bool(jnp.all(jnp.isfinite(value_est)))
    print("KERNEL_OK")
</pallas_src>

<mosaic_0001>
module attributes {stable_mosaic.version = 11 : i64} {
  func.func @model_kernel(%arg0: i32, %arg1: memref<16xi32, #tpu.memory_space<smem>>, %arg2: memref<64x32xf32, #tpu.memory_space<vmem>>, %arg3: memref<8x32xf32, #tpu.memory_space<vmem>>, %arg4: memref<2x7x128xf32, #tpu.memory_space<vmem>>, %arg5: memref<2x12x1x8xf32, #tpu.memory_space<vmem>>, %arg6: memref<2x12x32x8xbf16, #tpu.memory_space<vmem>>, %arg7: memref<2x4x8x32xbf16, #tpu.memory_space<vmem>>, %arg8: memref<2x32x128xbf16, #tpu.memory_space<vmem>>, %arg9: memref<2x128x32xbf16, #tpu.memory_space<vmem>>, %arg10: memref<4x128xf32, #tpu.memory_space<vmem>>, %arg11: memref<32x256xbf16, #tpu.memory_space<vmem>>, %arg12: memref<128x128xbf16, #tpu.memory_space<vmem>>, %arg13: memref<8x128xf32, #tpu.memory_space<vmem>>, %arg14: memref<8x32xf32, #tpu.memory_space<vmem>>) attributes {dimension_semantics = [#tpu.dimension_semantics<parallel>], iteration_bounds = array<i64: 2>, scalar_prefetch = 1 : i64, scratch_operands = 1 : i64, tpu.core_type = #tpu.core_type<tc>, window_params = [{pipeline_mode = #tpu.pipeline_mode<synchronous>, transform_indices = @transform_0, window_bounds = array<i64: 64, 32>}, {pipeline_mode = #tpu.pipeline_mode<synchronous>, transform_indices = @transform_1, window_bounds = array<i64: 8, 32>}, {pipeline_mode = #tpu.pipeline_mode<synchronous>, transform_indices = @transform_2, window_bounds = array<i64: 2, 7, 128>}, {pipeline_mode = #tpu.pipeline_mode<synchronous>, transform_indices = @transform_3, window_bounds = array<i64: 2, 12, 1, 8>}, {pipeline_mode = #tpu.pipeline_mode<synchronous>, transform_indices = @transform_4, window_bounds = array<i64: 2, 12, 32, 8>}, {pipeline_mode = #tpu.pipeline_mode<synchronous>, transform_indices = @transform_5, window_bounds = array<i64: 2, 4, 8, 32>}, {pipeline_mode = #tpu.pipeline_mode<synchronous>, transform_indices = @transform_6, window_bounds = array<i64: 2, 32, 128>}, {pipeline_mode = #tpu.pipeline_mode<synchronous>, transform_indices = @transform_7, window_bounds = array<i64: 2, 128, 32>}, {pipeline_mode = #tpu.pipeline_mode<synchronous>, transform_indices = @transform_8, window_bounds = array<i64: 4, 128>}, {pipeline_mode = #tpu.pipeline_mode<synchronous>, transform_indices = @transform_9, window_bounds = array<i64: 32, 256>}, {pipeline_mode = #tpu.pipeline_mode<synchronous>, transform_indices = @transform_10, window_bounds = array<i64: 128, 128>}, {transform_indices = @transform_11, window_bounds = array<i64: 8, 128>}]} {
    %c8_i32 = arith.constant 8 : i32
    %0 = arith.muli %arg0, %c8_i32 : i32
    %c0_i32 = arith.constant 0 : i32
    %1 = arith.addi %0, %c0_i32 : i32
    %2 = arith.index_cast %1 : i32 to index
    %3 = memref.load %arg1[%2] : memref<16xi32, #tpu.memory_space<smem>>
    %4 = arith.index_cast %3 : i32 to index
    %c0 = arith.constant 0 : index
    %5 = vector.load %arg2[%4, %c0] : memref<64x32xf32, #tpu.memory_space<vmem>>, vector<1x32xf32>
    %c0_0 = arith.constant 0 : index
    %c0_1 = arith.constant 0 : index
    %6 = vector.load %arg14[%c0_0, %c0_1] : memref<8x32xf32, #tpu.memory_space<vmem>>, vector<1x32xf32>
    tpu.vector_store %arg14[%c0_0, %c0_1], %5 {strides = array<i32>} : memref<8x32xf32, #tpu.memory_space<vmem>>, vector<1x32xf32>,
    %c8_i32_2 = arith.constant 8 : i32
    %7 = arith.muli %arg0, %c8_i32_2 : i32
    %c1_i32 = arith.constant 1 : i32
    %8 = arith.addi %7, %c1_i32 : i32
    %9 = arith.index_cast %8 : i32 to index
    %10 = memref.load %arg1[%9] : memref<16xi32, #tpu.memory_space<smem>>
    %11 = arith.index_cast %10 : i32 to index
    %c0_3 = arith.constant 0 : index
    %12 = vector.load %arg2[%11, %c0_3] : memref<64x32xf32, #tpu.memory_space<vmem>>, vector<1x32xf32>
    %c1 = arith.constant 1 : index
    %c0_4 = arith.constant 0 : index
    %13 = vector.load %arg14[%c1, %c0_4] : memref<8x32xf32, #tpu.memory_space<vmem>>, vector<1x32xf32>
    tpu.vector_store %arg14[%c1, %c0_4], %12 {strides = array<i32>} : memref<8x32xf32, #tpu.memory_space<vmem>>, vector<1x32xf32>,
    %c8_i32_5 = arith.constant 8 : i32
    %14 = arith.muli %arg0, %c8_i32_5 : i32
    %c2_i32 = arith.constant 2 : i32
    %15 = arith.addi %14, %c2_i32 : i32
    %16 = arith.index_cast %15 : i32 to index
    %17 = memref.load %arg1[%16] : memref<16xi32, #tpu.memory_space<smem>>
    %18 = arith.index_cast %17 : i32 to index
    %c0_6 = arith.constant 0 : index
    %19 = vector.load %arg2[%18, %c0_6] : memref<64x32xf32, #tpu.memory_space<vmem>>, vector<1x32xf32>
    %c2 = arith.constant 2 : index
    %c0_7 = arith.constant 0 : index
    %20 = vector.load %arg14[%c2, %c0_7] : memref<8x32xf32, #tpu.memory_space<vmem>>, vector<1x32xf32>
    tpu.vector_store %arg14[%c2, %c0_7], %19 {strides = array<i32>} : memref<8x32xf32, #tpu.memory_space<vmem>>, vector<1x32xf32>,
    %c8_i32_8 = arith.constant 8 : i32
    %21 = arith.muli %arg0, %c8_i32_8 : i32
    %c3_i32 = arith.constant 3 : i32
    %22 = arith.addi %21, %c3_i32 : i32
    %23 = arith.index_cast %22 : i32 to index
    %24 = memref.load %arg1[%23] : memref<16xi32, #tpu.memory_space<smem>>
    %25 = arith.index_cast %24 : i32 to index
    %c0_9 = arith.constant 0 : index
    %26 = vector.load %arg2[%25, %c0_9] : memref<64x32xf32, #tpu.memory_space<vmem>>, vector<1x32xf32>
    %c3 = arith.constant 3 : index
    %c0_10 = arith.constant 0 : index
    %27 = vector.load %arg14[%c3, %c0_10] : memref<8x32xf32, #tpu.memory_space<vmem>>, vector<1x32xf32>
    tpu.vector_store %arg14[%c3, %c0_10], %26 {strides = array<i32>} : memref<8x32xf32, #tpu.memory_space<vmem>>, vector<1x32xf32>,
    %c8_i32_11 = arith.constant 8 : i32
    %28 = arith.muli %arg0, %c8_i32_11 : i32
    %c4_i32 = arith.constant 4 : i32
    %29 = arith.addi %28, %c4_i32 : i32
    %30 = arith.index_cast %29 : i32 to index
    %31 = memref.load %arg1[%30] : memref<16xi32, #tpu.memory_space<smem>>
    %32 = arith.index_cast %31 : i32 to index
    %c0_12 = arith.constant 0 : index
    %33 = vector.load %arg2[%32, %c0_12] : memref<64x32xf32, #tpu.memory_space<vmem>>, vector<1x32xf32>
    %c4 = arith.constant 4 : index
    %c0_13 = arith.constant 0 : index
    %34 = vector.load %arg14[%c4, %c0_13] : memref<8x32xf32, #tpu.memory_space<vmem>>, vector<1x32xf32>
    tpu.vector_store %arg14[%c4, %c0_13], %33 {strides = array<i32>} : memref<8x32xf32, #tpu.memory_space<vmem>>, vector<1x32xf32>,
    %c8_i32_14 = arith.constant 8 : i32
    %35 = arith.muli %arg0, %c8_i32_14 : i32
    %c5_i32 = arith.constant 5 : i32
    %36 = arith.addi %35, %c5_i32 : i32
    %37 = arith.index_cast %36 : i32 to index
    %38 = memref.load %arg1[%37] : memref<16xi32, #tpu.memory_space<smem>>
    %39 = arith.index_cast %38 : i32 to index
    %c0_15 = arith.constant 0 : index
    %40 = vector.load %arg2[%39, %c0_15] : memref<64x32xf32, #tpu.memory_space<vmem>>, vector<1x32xf32>
    %c5 = arith.constant 5 : index
    %c0_16 = arith.constant 0 : index
    %41 = vector.load %arg14[%c5, %c0_16] : memref<8x32xf32, #tpu.memory_space<vmem>>, vector<1x32xf32>
    tpu.vector_store %arg14[%c5, %c0_16], %40 {strides = array<i32>} : memref<8x32xf32, #tpu.memory_space<vmem>>, vector<1x32xf32>,
    %c8_i32_17 = arith.constant 8 : i32
    %42 = arith.muli %arg0, %c8_i32_17 : i32
    %c6_i32 = arith.constant 6 : i32
    %43 = arith.addi %42, %c6_i32 : i32
    %44 = arith.index_cast %43 : i32 to index
    %45 = memref.load %arg1[%44] : memref<16xi32, #tpu.memory_space<smem>>
    %46 = arith.index_cast %45 : i32 to index
    %c0_18 = arith.constant 0 : index
    %47 = vector.load %arg2[%46, %c0_18] : memref<64x32xf32, #tpu.memory_space<vmem>>, vector<1x32xf32>
    %c6 = arith.constant 6 : index
    %c0_19 = arith.constant 0 : index
    %48 = vector.load %arg14[%c6, %c0_19] : memref<8x32xf32, #tpu.memory_space<vmem>>, vector<1x32xf32>
    tpu.vector_store %arg14[%c6, %c0_19], %47 {strides = array<i32>} : memref<8x32xf32, #tpu.memory_space<vmem>>, vector<1x32xf32>,
    %c8_i32_20 = arith.constant 8 : i32
    %49 = arith.muli %arg0, %c8_i32_20 : i32
    %c7_i32 = arith.constant 7 : i32
    %50 = arith.addi %49, %c7_i32 : i32
    %51 = arith.index_cast %50 : i32 to index
    %52 = memref.load %arg1[%51] : memref<16xi32, #tpu.memory_space<smem>>
    %53 = arith.index_cast %52 : i32 to index
    %c0_21 = arith.constant 0 : index
    %54 = vector.load %arg2[%53, %c0_21] : memref<64x32xf32, #tpu.memory_space<vmem>>, vector<1x32xf32>
    %c7 = arith.constant 7 : index
    %c0_22 = arith.constant 0 : index
    %55 = vector.load %arg14[%c7, %c0_22] : memref<8x32xf32, #tpu.memory_space<vmem>>, vector<1x32xf32>
    tpu.vector_store %arg14[%c7, %c0_22], %54 {strides = array<i32>} : memref<8x32xf32, #tpu.memory_space<vmem>>, vector<1x32xf32>,
    %c0_23 = arith.constant 0 : index
    %c0_24 = arith.constant 0 : index
    %56 = vector.load %arg14[%c0_23, %c0_24] : memref<8x32xf32, #tpu.memory_space<vmem>>, vector<8x32xf32>
    %c0_25 = arith.constant 0 : index
    %c0_26 = arith.constant 0 : index
    %57 = vector.load %arg3[%c0_25, %c0_26] : memref<8x32xf32, #tpu.memory_space<vmem>>, vector<8x32xf32>
    %58 = arith.addf %56, %57 : vector<8x32xf32>
    %59 = tpu.iota {dimensions = array<i32: 0>} : vector<8x8xi32>
    %60 = tpu.iota {dimensions = array<i32: 1>} : vector<8x8xi32>
    %61 = arith.cmpi sge, %59, %60 : vector<8x8xi32>
    %62 = vector.shape_cast %61 : vector<8x8xi1> to vector<1x8x8xi1>
    %c0_27 = arith.constant 0 : index
    %c0_28 = arith.constant 0 : index
    %c0_29 = arith.constant 0 : index
    %63 = vector.load %arg4[%c0_27, %c0_28, %c0_29] : memref<2x7x128xf32, #tpu.memory_space<vmem>>, vector<1x1x32xf32>
    %64 = vector.shape_cast %63 : vector<1x1x32xf32> to vector<1x32xf32>
    %c0_30 = arith.constant 0 : index
    %c1_31 = arith.constant 1 : index
    %c0_32 = arith.constant 0 : index
    %65 = vector.load %arg4[%c0_30, %c1_31, %c0_32] : memref<2x7x128xf32, #tpu.memory_space<vmem>>, vector<1x1x32xf32>
    %66 = vector.shape_cast %65 : vector<1x1x32xf32> to vector<1x32xf32>
    %c0_33 = arith.constant 0 : index
    %c2_34 = arith.constant 2 : index
    %c0_35 = arith.constant 0 : index
    %67 = vector.load %arg4[%c0_33, %c2_34, %c0_35] : memref<2x7x128xf32, #tpu.memory_space<vmem>>, vector<1x1x32xf32>
    %68 = vector.shape_cast %67 : vector<1x1x32xf32> to vector<1x32xf32>
    %c0_36 = arith.constant 0 : index
    %c3_37 = arith.constant 3 : index
    %c0_38 = arith.constant 0 : index
    %69 = vector.load %arg4[%c0_36, %c3_37, %c0_38] : memref<2x7x128xf32, #tpu.memory_space<vmem>>, vector<1x1x32xf32>
    %70 = vector.shape_cast %69 : vector<1x1x32xf32> to vector<1x32xf32>
    %c0_39 = arith.constant 0 : index
    %c4_40 = arith.constant 4 : index
    %c0_41 = arith.constant 0 : index
    %71 = vector.load %arg4[%c0_39, %c4_40, %c0_41] : memref<2x7x128xf32, #tpu.memory_space<vmem>>, vector<1x1x32xf32>
    %72 = vector.shape_cast %71 : vector<1x1x32xf32> to vector<1x32xf32>
    %c0_42 = arith.constant 0 : index
    %c5_43 = arith.constant 5 : index
    %c0_44 = arith.constant 0 : index
    %73 = vector.load %arg4[%c0_42, %c5_43, %c0_44] : memref<2x7x128xf32, #tpu.memory_space<vmem>>, vector<1x1x32xf32>
    %74 = vector.shape_cast %73 : vector<1x1x32xf32> to vector<1x32xf32>
    %c0_45 = arith.constant 0 : index
    %c6_46 = arith.constant 6 : index
    %c0_47 = arith.constant 0 : index
    %75 = vector.load %arg4[%c0_45, %c6_46, %c0_47] : memref<2x7x128xf32, #tpu.memory_space<vmem>>, vector<1x1x128xf32>
    %76 = vector.shape_cast %75 : vector<1x1x128xf32> to vector<1x128xf32>
    %cst = arith.constant dense<0.000000e+00> : vector<8xf32>
    %77 = vector.multi_reduction <add>, %58, %cst [1] : vector<8x32xf32> to vector<8xf32>
    %78 = vector.shape_cast %77 : vector<8xf32> to vector<8x1xf32>
    %cst_48 = arith.constant 3.200000e+01 : f32
    %79 = vector.broadcast %cst_48 : f32 to vector<8x1xf32>
    %80 = arith.divf %78, %79 : vector<8x1xf32>
    %81 = vector.broadcast %80 : vector<8x1xf32> to vector<8x32xf32>
    %82 = arith.subf %58, %81 : vector<8x32xf32>
    %83 = arith.mulf %82, %82 : vector<8x32xf32>
    %cst_49 = arith.constant dense<0.000000e+00> : vector<8xf32>
    %84 = vector.multi_reduction <add>, %83, %cst_49 [1] : vector<8x32xf32> to vector<8xf32>
    %85 = vector.shape_cast %84 : vector<8xf32> to vector<8x1xf32>
    %cst_50 = arith.constant 3.200000e+01 : f32
    %86 = vector.broadcast %cst_50 : f32 to vector<8x1xf32>
    %87 = arith.divf %85, %86 : vector<8x1xf32>
    %88 = vector.broadcast %80 : vector<8x1xf32> to vector<8x32xf32>
    %89 = arith.subf %58, %88 : vector<8x32xf32>
    %cst_51 = arith.constant 9.99999974E-6 : f32
    %90 = vector.broadcast %cst_51 : f32 to vector<8x1xf32>
    %91 = arith.addf %87, %90 : vector<8x1xf32>
    %92 = math.rsqrt %91 : vector<8x1xf32>
    %93 = vector.broadcast %92 : vector<8x1xf32> to vector<8x32xf32>
    %94 = arith.mulf %89, %93 : vector<8x32xf32>
    %95 = vector.broadcast %64 : vector<1x32xf32> to vector<8x32xf32>
    %96 = arith.mulf %94, %95 : vector<8x32xf32>
    %97 = vector.broadcast %66 : vector<1x32xf32> to vector<8x32xf32>
    %98 = arith.addf %96, %97 : vector<8x32xf32>
    %99 = arith.truncf %98 : vector<8x32xf32> to vector<8x32xbf16>
    %100 = vector.shape_cast %99 : vector<8x32xbf16> to vector<1x8x32xbf16>
    %101 = vector.broadcast %100 : vector<1x8x32xbf16> to vector<12x8x32xbf16>
    %c0_52 = arith.constant 0 : index
    %c0_53 = arith.constant 0 : index
    %c0_54 = arith.constant 0 : index
    %c0_55 = arith.constant 0 : index
    %102 = vector.load %arg6[%c0_52, %c0_53, %c0_54, %c0_55] : memref<2x12x32x8xbf16, #tpu.memory_space<vmem>>, vector<1x12x32x8xbf16>
    %103 = vector.shape_cast %102 : vector<1x12x32x8xbf16> to vector<12x32x8xbf16>
    "tpu.trace_start"() <{level = 10 : i32, message = "gnd,gdk->gnk"}> : () -> ()
    %cst_56 = arith.constant dense<0.000000e+00> : vector<12x8x8xf32>
    %104 = tpu.matmul %101, %103, %cst_56 {dimension_numbers = #tpu.dot_dimension_numbers<[2], [1], [1], [2], [0, 0, 0, 1, 1, 2], [0], [0]>} : vector<12x8x32xbf16>, vector<12x32x8xbf16>, vector<12x8x8xf32> -> vector<12x8x8xf32>
    "tpu.trace_stop"() : () -> ()
    %c0_57 = arith.constant 0 : index
    %c0_58 = arith.constant 0 : index
    %c0_59 = arith.constant 0 : index
    %c0_60 = arith.constant 0 : index
    %105 = vector.load %arg5[%c0_57, %c0_58, %c0_59, %c0_60] : memref<2x12x1x8xf32, #tpu.memory_space<vmem>>, vector<1x12x1x8xf32>
    %106 = vector.shape_cast %105 : vector<1x12x1x8xf32> to vector<12x1x8xf32>
    %107 = vector.broadcast %106 : vector<12x1x8xf32> to vector<12x8x8xf32>
    %108 = arith.addf %104, %107 : vector<12x8x8xf32>
    %109 = arith.truncf %108 : vector<12x8x8xf32> to vector<12x8x8xbf16>
    %110 = vector.extract_strided_slice %109 {offsets = [0, 0, 0], sizes = [4, 8, 8], strides = [1, 1, 1]} : vector<12x8x8xbf16> to vector<4x8x8xbf16>
    %111 = vector.extract_strided_slice %109 {offsets = [4, 0, 0], sizes = [4, 8, 8], strides = [1, 1, 1]} : vector<12x8x8xbf16> to vector<4x8x8xbf16>
    %112 = vector.extract_strided_slice %109 {offsets = [8, 0, 0], sizes = [4, 8, 8], strides = [1, 1, 1]} : vector<12x8x8xbf16> to vector<4x8x8xbf16>
    "tpu.trace_start"() <{level = 10 : i32, message = "hqd,hkd->hqk"}> : () -> ()
    %cst_61 = arith.constant dense<0.000000e+00> : vector<4x8x8xf32>
    %113 = tpu.matmul %110, %111, %cst_61 {dimension_numbers = #tpu.dot_dimension_numbers<[2], [2], [1], [1], [0, 0, 0, 1, 1, 1], [0], [0]>} : vector<4x8x8xbf16>, vector<4x8x8xbf16>, vector<4x8x8xf32> -> vector<4x8x8xf32>
    "tpu.trace_stop"() : () -> ()
    %cst_62 = arith.constant 0.353553385 : f32
    %114 = vector.broadcast %cst_62 : f32 to vector<4x8x8xf32>
    %115 = arith.mulf %113, %114 : vector<4x8x8xf32>
    %cst_63 = arith.constant -1.000000e+30 : f32
    %116 = vector.shape_cast %62 : vector<1x8x8xi1> to vector<1x8x8xi1>
    %117 = vector.broadcast %116 : vector<1x8x8xi1> to vector<4x8x8xi1>
    %118 = vector.broadcast %cst_63 : f32 to vector<4x8x8xf32>
    %119 = arith.select %117, %115, %118 : vector<4x8x8xi1>, vector<4x8x8xf32>
    %cst_64 = arith.constant dense<0xFF800000> : vector<4x8xf32>
    %120 = vector.multi_reduction <maximumf>, %119, %cst_64 [2] : vector<4x8x8xf32> to vector<4x8xf32>
    %121 = vector.shape_cast %120 : vector<4x8xf32> to vector<4x8x1xf32>
    %122 = vector.broadcast %121 : vector<4x8x1xf32> to vector<4x8x8xf32>
    %123 = arith.subf %119, %122 : vector<4x8x8xf32>
    %124 = math.exp %123 : vector<4x8x8xf32>
    %cst_65 = arith.constant dense<0.000000e+00> : vector<4x8xf32>
    %125 = vector.multi_reduction <add>, %124, %cst_65 [2] : vector<4x8x8xf32> to vector<4x8xf32>
    %126 = vector.shape_cast %125 : vector<4x8xf32> to vector<4x8x1xf32>
    %127 = tpu.reciprocal %126 {approx = true} : vector<4x8x1xf32> -> vector<4x8x1xf32>
    %128 = vector.broadcast %127 : vector<4x8x1xf32> to vector<4x8x8xf32>
    %129 = arith.mulf %124, %128 : vector<4x8x8xf32>
    %130 = arith.truncf %129 : vector<4x8x8xf32> to vector<4x8x8xbf16>
    "tpu.trace_start"() <{level = 10 : i32, message = "hqk,hkd->hqd"}> : () -> ()
    %cst_66 = arith.constant dense<0.000000e+00> : vector<4x8x8xf32>
    %131 = tpu.matmul %130, %112, %cst_66 {dimension_numbers = #tpu.dot_dimension_numbers<[2], [1], [1], [2], [0, 0, 0, 1, 1, 2], [0], [0]>} : vector<4x8x8xbf16>, vector<4x8x8xbf16>, vector<4x8x8xf32> -> vector<4x8x8xf32>
    "tpu.trace_stop"() : () -> ()
    %132 = arith.truncf %131 : vector<4x8x8xf32> to vector<4x8x8xbf16>
    %c0_67 = arith.constant 0 : index
    %c0_68 = arith.constant 0 : index
    %c0_69 = arith.constant 0 : index
    %c0_70 = arith.constant 0 : index
    %133 = vector.load %arg7[%c0_67, %c0_68, %c0_69, %c0_70] : memref<2x4x8x32xbf16, #tpu.memory_space<vmem>>, vector<1x4x8x32xbf16>
    %134 = vector.shape_cast %133 : vector<1x4x8x32xbf16> to vector<4x8x32xbf16>
    "tpu.trace_start"() <{level = 10 : i32, message = "hqd,hdm->hqm"}> : () -> ()
    %cst_71 = arith.constant dense<0.000000e+00> : vector<4x8x32xf32>
    %135 = tpu.matmul %132, %134, %cst_71 {dimension_numbers = #tpu.dot_dimension_numbers<[2], [1], [1], [2], [0, 0, 0, 1, 1, 2], [0], [0]>} : vector<4x8x8xbf16>, vector<4x8x32xbf16>, vector<4x8x32xf32> -> vector<4x8x32xf32>
    "tpu.trace_stop"() : () -> ()
    %cst_72 = arith.constant dense<0.000000e+00> : vector<8x32xf32>
    %136 = vector.multi_reduction <add>, %135, %cst_72 [0] : vector<4x8x32xf32> to vector<8x32xf32>
    %137 = arith.addf %58, %136 : vector<8x32xf32>
    %138 = vector.broadcast %72 : vector<1x32xf32> to vector<8x32xf32>
    %139 = arith.addf %137, %138 : vector<8x32xf32>
    %cst_73 = arith.constant dense<0.000000e+00> : vector<8xf32>
    %140 = vector.multi_reduction <add>, %139, %cst_73 [1] : vector<8x32xf32> to vector<8xf32>
    %141 = vector.shape_cast %140 : vector<8xf32> to vector<8x1xf32>
    %cst_74 = arith.constant 3.200000e+01 : f32
    %142 = vector.broadcast %cst_74 : f32 to vector<8x1xf32>
    %143 = arith.divf %141, %142 : vector<8x1xf32>
    %144 = vector.broadcast %143 : vector<8x1xf32> to vector<8x32xf32>
    %145 = arith.subf %139, %144 : vector<8x32xf32>
    %146 = arith.mulf %145, %145 : vector<8x32xf32>
    %cst_75 = arith.constant dense<0.000000e+00> : vector<8xf32>
    %147 = vector.multi_reduction <add>, %146, %cst_75 [1] : vector<8x32xf32> to vector<8xf32>
    %148 = vector.shape_cast %147 : vector<8xf32> to vector<8x1xf32>
    %cst_76 = arith.constant 3.200000e+01 : f32
    %149 = vector.broadcast %cst_76 : f32 to vector<8x1xf32>
    %150 = arith.divf %148, %149 : vector<8x1xf32>
    %151 = vector.broadcast %143 : vector<8x1xf32> to vector<8x32xf32>
    %152 = arith.subf %139, %151 : vector<8x32xf32>
    %cst_77 = arith.constant 9.99999974E-6 : f32
    %153 = vector.broadcast %cst_77 : f32 to vector<8x1xf32>
    %154 = arith.addf %150, %153 : vector<8x1xf32>
    %155 = math.rsqrt %154 : vector<8x1xf32>
    %156 = vector.broadcast %155 : vector<8x1xf32> to vector<8x32xf32>
    %157 = arith.mulf %152, %156 : vector<8x32xf32>
    %158 = vector.broadcast %68 : vector<1x32xf32> to vector<8x32xf32>
    %159 = arith.mulf %157, %158 : vector<8x32xf32>
    %160 = vector.broadcast %70 : vector<1x32xf32> to vector<8x32xf32>
    %161 = arith.addf %159, %160 : vector<8x32xf32>
    %162 = arith.truncf %161 : vector<8x32xf32> to vector<8x32xbf16>
    %c0_78 = arith.constant 0 : index
    %c0_79 = arith.constant 0 : index
    %c0_80 = arith.constant 0 : index
    %163 = vector.load %arg8[%c0_78, %c0_79, %c0_80] : memref<2x32x128xbf16, #tpu.memory_space<vmem>>, vector<1x32x128xbf16>
    %164 = vector.shape_cast %163 : vector<1x32x128xbf16> to vector<32x128xbf16>
    %cst_81 = arith.constant dense<0.000000e+00> : vector<8x128xf32>
    %165 = tpu.matmul %162, %164, %cst_81 {dimension_numbers = #tpu.dot_dimension_numbers<[1], [0], [0], [1], [0, 0, 1, 1], [], []>} : vector<8x32xbf16>, vector<32x128xbf16>, vector<8x128xf32> -> vector<8x128xf32>
    %166 = vector.broadcast %76 : vector<1x128xf32> to vector<8x128xf32>
    %167 = arith.addf %165, %166 : vector<8x128xf32>
    %168 = arith.mulf %167, %167 : vector<8x128xf32>
    %169 = arith.mulf %167, %168 : vector<8x128xf32>
    %cst_82 = arith.constant 4.471500e-02 : f32
    %170 = vector.broadcast %cst_82 : f32 to vector<8x128xf32>
    %171 = arith.mulf %170, %169 : vector<8x128xf32>
    %172 = arith.addf %167, %171 : vector<8x128xf32>
    %cst_83 = arith.constant 0.797884583 : f32
    %173 = vector.broadcast %cst_83 : f32 to vector<8x128xf32>
    %174 = arith.mulf %173, %172 : vector<8x128xf32>
    %175 = math.tanh %174 : vector<8x128xf32>
    %cst_84 = arith.constant 1.000000e+00 : f32
    %176 = vector.broadcast %cst_84 : f32 to vector<8x128xf32>
    %177 = arith.addf %176, %175 : vector<8x128xf32>
    %cst_85 = arith.constant 5.000000e-01 : f32
    %178 = vector.broadcast %cst_85 : f32 to vector<8x128xf32>
    %179 = arith.mulf %178, %177 : vector<8x128xf32>
    %180 = arith.mulf %167, %179 : vector<8x128xf32>
    %181 = arith.truncf %180 : vector<8x128xf32> to vector<8x128xbf16>
    %c0_86 = arith.constant 0 : index
    %c0_87 = arith.constant 0 : index
    %c0_88 = arith.constant 0 : index
    %182 = vector.load %arg9[%c0_86, %c0_87, %c0_88] : memref<2x128x32xbf16, #tpu.memory_space<vmem>>, vector<1x128x32xbf16>
    %183 = vector.shape_cast %182 : vector<1x128x32xbf16> to vector<128x32xbf16>
    %cst_89 = arith.constant dense<0.000000e+00> : vector<8x32xf32>
    %184 = tpu.matmul %181, %183, %cst_89 {dimension_numbers = #tpu.dot_dimension_numbers<[1], [0], [0], [1], [0, 0, 1, 1], [], []>} : vector<8x128xbf16>, vector<128x32xbf16>, vector<8x32xf32> -> vector<8x32xf32>
    %185 = arith.addf %139, %184 : vector<8x32xf32>
    %186 = vector.broadcast %74 : vector<1x32xf32> to vector<8x32xf32>
    %187 = arith.addf %185, %186 : vector<8x32xf32>
    %c1_90 = arith.constant 1 : index
    %c0_91 = arith.constant 0 : index
    %c0_92 = arith.constant 0 : index
    %188 = vector.load %arg4[%c1_90, %c0_91, %c0_92] : memref<2x7x128xf32, #tpu.memory_space<vmem>>, vector<1x1x32xf32>
    %189 = vector.shape_cast %188 : vector<1x1x32xf32> to vector<1x32xf32>
    %c1_93 = arith.constant 1 : index
    %c1_94 = arith.constant 1 : index
    %c0_95 = arith.constant 0 : index
    %190 = vector.load %arg4[%c1_93, %c1_94, %c0_95] : memref<2x7x128xf32, #tpu.memory_space<vmem>>, vector<1x1x32xf32>
    %191 = vector.shape_cast %190 : vector<1x1x32xf32> to vector<1x32xf32>
    %c1_96 = arith.constant 1 : index
    %c2_97 = arith.constant 2 : index
    %c0_98 = arith.constant 0 : index
    %192 = vector.load %arg4[%c1_96, %c2_97, %c0_98] : memref<2x7x128xf32, #tpu.memory_space<vmem>>, vector<1x1x32xf32>
    %193 = vector.shape_cast %192 : vector<1x1x32xf32> to vector<1x32xf32>
    %c1_99 = arith.constant 1 : index
    %c3_100 = arith.constant 3 : index
    %c0_101 = arith.constant 0 : index
    %194 = vector.load %arg4[%c1_99, %c3_100, %c0_101] : memref<2x7x128xf32, #tpu.memory_space<vmem>>, vector<1x1x32xf32>
    %195 = vector.shape_cast %194 : vector<1x1x32xf32> to vector<1x32xf32>
    %c1_102 = arith.constant 1 : index
    %c4_103 = arith.constant 4 : index
    %c0_104 = arith.constant 0 : index
    %196 = vector.load %arg4[%c1_102, %c4_103, %c0_104] : memref<2x7x128xf32, #tpu.memory_space<vmem>>, vector<1x1x32xf32>
    %197 = vector.shape_cast %196 : vector<1x1x32xf32> to vector<1x32xf32>
    %c1_105 = arith.constant 1 : index
    %c5_106 = arith.constant 5 : index
    %c0_107 = arith.constant 0 : index
    %198 = vector.load %arg4[%c1_105, %c5_106, %c0_107] : memref<2x7x128xf32, #tpu.memory_space<vmem>>, vector<1x1x32xf32>
    %199 = vector.shape_cast %198 : vector<1x1x32xf32> to vector<1x32xf32>
    %c1_108 = arith.constant 1 : index
    %c6_109 = arith.constant 6 : index
    %c0_110 = arith.constant 0 : index
    %200 = vector.load %arg4[%c1_108, %c6_109, %c0_110] : memref<2x7x128xf32, #tpu.memory_space<vmem>>, vector<1x1x128xf32>
    %201 = vector.shape_cast %200 : vector<1x1x128xf32> to vector<1x128xf32>
    %cst_111 = arith.constant dense<0.000000e+00> : vector<8xf32>
    %202 = vector.multi_reduction <add>, %187, %cst_111 [1] : vector<8x32xf32> to vector<8xf32>
    %203 = vector.shape_cast %202 : vector<8xf32> to vector<8x1xf32>
    %cst_112 = arith.constant 3.200000e+01 : f32
    %204 = vector.broadcast %cst_112 : f32 to vector<8x1xf32>
    %205 = arith.divf %203, %204 : vector<8x1xf32>
    %206 = vector.broadcast %205 : vector<8x1xf32> to vector<8x32xf32>
    %207 = arith.subf %187, %206 : vector<8x32xf32>
    %208 = arith.mulf %207, %207 : vector<8x32xf32>
    %cst_113 = arith.constant dense<0.000000e+00> : vector<8xf32>
    %209 = vector.multi_reduction <add>, %208, %cst_113 [1] : vector<8x32xf32> to vector<8xf32>
    %210 = vector.shape_cast %209 : vector<8xf32> to vector<8x1xf32>
    %cst_114 = arith.constant 3.200000e+01 : f32
    %211 = vector.broadcast %cst_114 : f32 to vector<8x1xf32>
    %212 = arith.divf %210, %211 : vector<8x1xf32>
    %213 = vector.broadcast %205 : vector<8x1xf32> to vector<8x32xf32>
    %214 = arith.subf %187, %213 : vector<8x32xf32>
    %cst_115 = arith.constant 9.99999974E-6 : f32
    %215 = vector.broadcast %cst_115 : f32 to vector<8x1xf32>
    %216 = arith.addf %212, %215 : vector<8x1xf32>
    %217 = math.rsqrt %216 : vector<8x1xf32>
    %218 = vector.broadcast %217 : vector<8x1xf32> to vector<8x32xf32>
    %219 = arith.mulf %214, %218 : vector<8x32xf32>
    %220 = vector.broadcast %189 : vector<1x32xf32> to vector<8x32xf32>
    %221 = arith.mulf %219, %220 : vector<8x32xf32>
    %222 = vector.broadcast %191 : vector<1x32xf32> to vector<8x32xf32>
    %223 = arith.addf %221, %222 : vector<8x32xf32>
    %224 = arith.truncf %223 : vector<8x32xf32> to vector<8x32xbf16>
    %225 = vector.shape_cast %224 : vector<8x32xbf16> to vector<1x8x32xbf16>
    %226 = vector.broadcast %225 : vector<1x8x32xbf16> to vector<12x8x32xbf16>
    %c1_116 = arith.constant 1 : index
    %c0_117 = arith.constant 0 : index
    %c0_118 = arith.constant 0 : index
    %c0_119 = arith.constant 0 : index
    %227 = vector.load %arg6[%c1_116, %c0_117, %c0_118, %c0_119] : memref<2x12x32x8xbf16, #tpu.memory_space<vmem>>, vector<1x12x32x8xbf16>
    %228 = vector.shape_cast %227 : vector<1x12x32x8xbf16> to vector<12x32x8xbf16>
    "tpu.trace_start"() <{level = 10 : i32, message = "gnd,gdk->gnk"}> : () -> ()
    %cst_120 = arith.constant dense<0.000000e+00> : vector<12x8x8xf32>
    %229 = tpu.matmul %226, %228, %cst_120 {dimension_numbers = #tpu.dot_dimension_numbers<[2], [1], [1], [2], [0, 0, 0, 1, 1, 2], [0], [0]>} : vector<12x8x32xbf16>, vector<12x32x8xbf16>, vector<12x8x8xf32> -> vector<12x8x8xf32>
    "tpu.trace_stop"() : () -> ()
    %c1_121 = arith.constant 1 : index
    %c0_122 = arith.constant 0 : index
    %c0_123 = arith.constant 0 : index
    %c0_124 = arith.constant 0 : index
    %230 = vector.load %arg5[%c1_121, %c0_122, %c0_123, %c0_124] : memref<2x12x1x8xf32, #tpu.memory_space<vmem>>, vector<1x12x1x8xf32>
    %231 = vector.shape_cast %230 : vector<1x12x1x8xf32> to vector<12x1x8xf32>
    %232 = vector.broadcast %231 : vector<12x1x8xf32> to vector<12x8x8xf32>
    %233 = arith.addf %229, %232 : vector<12x8x8xf32>
    %234 = arith.truncf %233 : vector<12x8x8xf32> to vector<12x8x8xbf16>
    %235 = vector.extract_strided_slice %234 {offsets = [0, 0, 0], sizes = [4, 8, 8], strides = [1, 1, 1]} : vector<12x8x8xbf16> to vector<4x8x8xbf16>
    %236 = vector.extract_strided_slice %234 {offsets = [4, 0, 0], sizes = [4, 8, 8], strides = [1, 1, 1]} : vector<12x8x8xbf16> to vector<4x8x8xbf16>
    %237 = vector.extract_strided_slice %234 {offsets = [8, 0, 0], sizes = [4, 8, 8], strides = [1, 1, 1]} : vector<12x8x8xbf16> to vector<4x8x8xbf16>
    "tpu.trace_start"() <{level = 10 : i32, message = "hqd,hkd->hqk"}> : () -> ()
    %cst_125 = arith.constant dense<0.000000e+00> : vector<4x8x8xf32>
    %238 = tpu.matmul %235, %236, %cst_125 {dimension_numbers = #tpu.dot_dimension_numbers<[2], [2], [1], [1], [0, 0, 0, 1, 1, 1], [0], [0]>} : vector<4x8x8xbf16>, vector<4x8x8xbf16>, vector<4x8x8xf32> -> vector<4x8x8xf32>
    "tpu.trace_stop"() : () -> ()
    %cst_126 = arith.constant 0.353553385 : f32
    %239 = vector.broadcast %cst_126 : f32 to vector<4x8x8xf32>
    %240 = arith.mulf %238, %239 : vector<4x8x8xf32>
    %cst_127 = arith.constant -1.000000e+30 : f32
    %241 = vector.shape_cast %62 : vector<1x8x8xi1> to vector<1x8x8xi1>
    %242 = vector.broadcast %241 : vector<1x8x8xi1> to vector<4x8x8xi1>
    %243 = vector.broadcast %cst_127 : f32 to vector<4x8x8xf32>
    %244 = arith.select %242, %240, %243 : vector<4x8x8xi1>, vector<4x8x8xf32>
    %cst_128 = arith.constant dense<0xFF800000> : vector<4x8xf32>
    %245 = vector.multi_reduction <maximumf>, %244, %cst_128 [2] : vector<4x8x8xf32> to vector<4x8xf32>
    %246 = vector.shape_cast %245 : vector<4x8xf32> to vector<4x8x1xf32>
    %247 = vector.broadcast %246 : vector<4x8x1xf32> to vector<4x8x8xf32>
    %248 = arith.subf %244, %247 : vector<4x8x8xf32>
    %249 = math.exp %248 : vector<4x8x8xf32>
    %cst_129 = arith.constant dense<0.000000e+00> : vector<4x8xf32>
    %250 = vector.multi_reduction <add>, %249, %cst_129 [2] : vector<4x8x8xf32> to vector<4x8xf32>
    %251 = vector.shape_cast %250 : vector<4x8xf32> to vector<4x8x1xf32>
    %252 = tpu.reciprocal %251 {approx = true} : vector<4x8x1xf32> -> vector<4x8x1xf32>
    %253 = vector.broadcast %252 : vector<4x8x1xf32> to vector<4x8x8xf32>
    %254 = arith.mulf %249, %253 : vector<4x8x8xf32>
    %255 = arith.truncf %254 : vector<4x8x8xf32> to vector<4x8x8xbf16>
    "tpu.trace_start"() <{level = 10 : i32, message = "hqk,hkd->hqd"}> : () -> ()
    %cst_130 = arith.constant dense<0.000000e+00> : vector<4x8x8xf32>
    %256 = tpu.matmul %255, %237, %cst_130 {dimension_numbers = #tpu.dot_dimension_numbers<[2], [1], [1], [2], [0, 0, 0, 1, 1, 2], [0], [0]>} : vector<4x8x8xbf16>, vector<4x8x8xbf16>, vector<4x8x8xf32> -> vector<4x8x8xf32>
    "tpu.trace_stop"() : () -> ()
    %257 = arith.truncf %256 : vector<4x8x8xf32> to vector<4x8x8xbf16>
    %c1_131 = arith.constant 1 : index
    %c0_132 = arith.constant 0 : index
    %c0_133 = arith.constant 0 : index
    %c0_134 = arith.constant 0 : index
    %258 = vector.load %arg7[%c1_131, %c0_132, %c0_133, %c0_134] : memref<2x4x8x32xbf16, #tpu.memory_space<vmem>>, vector<1x4x8x32xbf16>
    %259 = vector.shape_cast %258 : vector<1x4x8x32xbf16> to vector<4x8x32xbf16>
    "tpu.trace_start"() <{level = 10 : i32, message = "hqd,hdm->hqm"}> : () -> ()
    %cst_135 = arith.constant dense<0.000000e+00> : vector<4x8x32xf32>
    %260 = tpu.matmul %257, %259, %cst_135 {dimension_numbers = #tpu.dot_dimension_numbers<[2], [1], [1], [2], [0, 0, 0, 1, 1, 2], [0], [0]>} : vector<4x8x8xbf16>, vector<4x8x32xbf16>, vector<4x8x32xf32> -> vector<4x8x32xf32>
    "tpu.trace_stop"() : () -> ()
    %cst_136 = arith.constant dense<0.000000e+00> : vector<8x32xf32>
    %261 = vector.multi_reduction <add>, %260, %cst_136 [0] : vector<4x8x32xf32> to vector<8x32xf32>
    %262 = arith.addf %187, %261 : vector<8x32xf32>
    %263 = vector.broadcast %197 : vector<1x32xf32> to vector<8x32xf32>
    %264 = arith.addf %262, %263 : vector<8x32xf32>
    %cst_137 = arith.constant dense<0.000000e+00> : vector<8xf32>
    %265 = vector.multi_reduction <add>, %264, %cst_137 [1] : vector<8x32xf32> to vector<8xf32>
    %266 = vector.shape_cast %265 : vector<8xf32> to vector<8x1xf32>
    %cst_138 = arith.constant 3.200000e+01 : f32
    %267 = vector.broadcast %cst_138 : f32 to vector<8x1xf32>
    %268 = arith.divf %266, %267 : vector<8x1xf32>
    %269 = vector.broadcast %268 : vector<8x1xf32> to vector<8x32xf32>
    %270 = arith.subf %264, %269 : vector<8x32xf32>
    %271 = arith.mulf %270, %270 : vector<8x32xf32>
    %cst_139 = arith.constant dense<0.000000e+00> : vector<8xf32>
    %272 = vector.multi_reduction <add>, %271, %cst_139 [1] : vector<8x32xf32> to vector<8xf32>
    %273 = vector.shape_cast %272 : vector<8xf32> to vector<8x1xf32>
    %cst_140 = arith.constant 3.200000e+01 : f32
    %274 = vector.broadcast %cst_140 : f32 to vector<8x1xf32>
    %275 = arith.divf %273, %274 : vector<8x1xf32>
    %276 = vector.broadcast %268 : vector<8x1xf32> to vector<8x32xf32>
    %277 = arith.subf %264, %276 : vector<8x32xf32>
    %cst_141 = arith.constant 9.99999974E-6 : f32
    %278 = vector.broadcast %cst_141 : f32 to vector<8x1xf32>
    %279 = arith.addf %275, %278 : vector<8x1xf32>
    %280 = math.rsqrt %279 : vector<8x1xf32>
    %281 = vector.broadcast %280 : vector<8x1xf32> to vector<8x32xf32>
    %282 = arith.mulf %277, %281 : vector<8x32xf32>
    %283 = vector.broadcast %193 : vector<1x32xf32> to vector<8x32xf32>
    %284 = arith.mulf %282, %283 : vector<8x32xf32>
    %285 = vector.broadcast %195 : vector<1x32xf32> to vector<8x32xf32>
    %286 = arith.addf %284, %285 : vector<8x32xf32>
    %287 = arith.truncf %286 : vector<8x32xf32> to vector<8x32xbf16>
    %c1_142 = arith.constant 1 : index
    %c0_143 = arith.constant 0 : index
    %c0_144 = arith.constant 0 : index
    %288 = vector.load %arg8[%c1_142, %c0_143, %c0_144] : memref<2x32x128xbf16, #tpu.memory_space<vmem>>, vector<1x32x128xbf16>
    %289 = vector.shape_cast %288 : vector<1x32x128xbf16> to vector<32x128xbf16>
    %cst_145 = arith.constant dense<0.000000e+00> : vector<8x128xf32>
    %290 = tpu.matmul %287, %289, %cst_145 {dimension_numbers = #tpu.dot_dimension_numbers<[1], [0], [0], [1], [0, 0, 1, 1], [], []>} : vector<8x32xbf16>, vector<32x128xbf16>, vector<8x128xf32> -> vector<8x128xf32>
    %291 = vector.broadcast %201 : vector<1x128xf32> to vector<8x128xf32>
    %292 = arith.addf %290, %291 : vector<8x128xf32>
    %293 = arith.mulf %292, %292 : vector<8x128xf32>
    %294 = arith.mulf %292, %293 : vector<8x128xf32>
    %cst_146 = arith.constant 4.471500e-02 : f32
    %295 = vector.broadcast %cst_146 : f32 to vector<8x128xf32>
    %296 = arith.mulf %295, %294 : vector<8x128xf32>
    %297 = arith.addf %292, %296 : vector<8x128xf32>
    %cst_147 = arith.constant 0.797884583 : f32
    %298 = vector.broadcast %cst_147 : f32 to vector<8x128xf32>
    %299 = arith.mulf %298, %297 : vector<8x128xf32>
    %300 = math.tanh %299 : vector<8x128xf32>
    %cst_148 = arith.constant 1.000000e+00 : f32
    %301 = vector.broadcast %cst_148 : f32 to vector<8x128xf32>
    %302 = arith.addf %301, %300 : vector<8x128xf32>
    %cst_149 = arith.constant 5.000000e-01 : f32
    %303 = vector.broadcast %cst_149 : f32 to vector<8x128xf32>
    %304 = arith.mulf %303, %302 : vector<8x128xf32>
    %305 = arith.mulf %292, %304 : vector<8x128xf32>
    %306 = arith.truncf %305 : vector<8x128xf32> to vector<8x128xbf16>
    %c1_150 = arith.constant 1 : index
    %c0_151 = arith.constant 0 : index
    %c0_152 = arith.constant 0 : index
    %307 = vector.load %arg9[%c1_150, %c0_151, %c0_152] : memref<2x128x32xbf16, #tpu.memory_space<vmem>>, vector<1x128x32xbf16>
    %308 = vector.shape_cast %307 : vector<1x128x32xbf16> to vector<128x32xbf16>
    %cst_153 = arith.constant dense<0.000000e+00> : vector<8x32xf32>
    %309 = tpu.matmul %306, %308, %cst_153 {dimension_numbers = #tpu.dot_dimension_numbers<[1], [0], [0], [1], [0, 0, 1, 1], [], []>} : vector<8x128xbf16>, vector<128x32xbf16>, vector<8x32xf32> -> vector<8x32xf32>
    %310 = arith.addf %264, %309 : vector<8x32xf32>
    %311 = vector.broadcast %199 : vector<1x32xf32> to vector<8x32xf32>
    %312 = arith.addf %310, %311 : vector<8x32xf32>
    %c0_154 = arith.constant 0 : index
    %c0_155 = arith.constant 0 : index
    %313 = vector.load %arg10[%c0_154, %c0_155] : memref<4x128xf32, #tpu.memory_space<vmem>>, vector<1x32xf32>
    %c1_156 = arith.constant 1 : index
    %c0_157 = arith.constant 0 : index
    %314 = vector.load %arg10[%c1_156, %c0_157] : memref<4x128xf32, #tpu.memory_space<vmem>>, vector<1x32xf32>
    %c2_158 = arith.constant 2 : index
    %c0_159 = arith.constant 0 : index
    %315 = vector.load %arg10[%c2_158, %c0_159] : memref<4x128xf32, #tpu.memory_space<vmem>>, vector<1x128xf32>
    %c3_160 = arith.constant 3 : index
    %c0_161 = arith.constant 0 : index
    %316 = vector.load %arg10[%c3_160, %c0_161] : memref<4x128xf32, #tpu.memory_space<vmem>>, vector<1x128xf32>
    %cst_162 = arith.constant dense<0.000000e+00> : vector<8xf32>
    %317 = vector.multi_reduction <add>, %312, %cst_162 [1] : vector<8x32xf32> to vector<8xf32>
    %318 = vector.shape_cast %317 : vector<8xf32> to vector<8x1xf32>
    %cst_163 = arith.constant 3.200000e+01 : f32
    %319 = vector.broadcast %cst_163 : f32 to vector<8x1xf32>
    %320 = arith.divf %318, %319 : vector<8x1xf32>
    %321 = vector.broadcast %320 : vector<8x1xf32> to vector<8x32xf32>
    %322 = arith.subf %312, %321 : vector<8x32xf32>
    %323 = arith.mulf %322, %322 : vector<8x32xf32>
    %cst_164 = arith.constant dense<0.000000e+00> : vector<8xf32>
    %324 = vector.multi_reduction <add>, %323, %cst_164 [1] : vector<8x32xf32> to vector<8xf32>
    %325 = vector.shape_cast %324 : vector<8xf32> to vector<8x1xf32>
    %cst_165 = arith.constant 3.200000e+01 : f32
    %326 = vector.broadcast %cst_165 : f32 to vector<8x1xf32>
    %327 = arith.divf %325, %326 : vector<8x1xf32>
    %328 = vector.broadcast %320 : vector<8x1xf32> to vector<8x32xf32>
    %329 = arith.subf %312, %328 : vector<8x32xf32>
    %cst_166 = arith.constant 9.99999974E-6 : f32
    %330 = vector.broadcast %cst_166 : f32 to vector<8x1xf32>
    %331 = arith.addf %327, %330 : vector<8x1xf32>
    %332 = math.rsqrt %331 : vector<8x1xf32>
    %333 = vector.broadcast %332 : vector<8x1xf32> to vector<8x32xf32>
    %334 = arith.mulf %329, %333 : vector<8x32xf32>
    %335 = vector.broadcast %313 : vector<1x32xf32> to vector<8x32xf32>
    %336 = arith.mulf %334, %335 : vector<8x32xf32>
    %337 = vector.broadcast %314 : vector<1x32xf32> to vector<8x32xf32>
    %338 = arith.addf %336, %337 : vector<8x32xf32>
    %339 = arith.truncf %338 : vector<8x32xf32> to vector<8x32xbf16>
    %c0_167 = arith.constant 0 : index
    %c0_168 = arith.constant 0 : index
    %340 = vector.load %arg11[%c0_167, %c0_168] : memref<32x256xbf16, #tpu.memory_space<vmem>>, vector<32x256xbf16>
    %cst_169 = arith.constant dense<0.000000e+00> : vector<8x256xf32>
    %341 = tpu.matmul %339, %340, %cst_169 {dimension_numbers = #tpu.dot_dimension_numbers<[1], [0], [0], [1], [0, 0, 1, 1], [], []>} : vector<8x32xbf16>, vector<32x256xbf16>, vector<8x256xf32> -> vector<8x256xf32>
    %342 = vector.extract_strided_slice %341 {offsets = [0, 0], sizes = [8, 128], strides = [1, 1]} : vector<8x256xf32> to vector<8x128xf32>
    %343 = vector.extract_strided_slice %341 {offsets = [0, 128], sizes = [8, 128], strides = [1, 1]} : vector<8x256xf32> to vector<8x128xf32>
    %344 = vector.broadcast %315 : vector<1x128xf32> to vector<8x128xf32>
    %345 = arith.addf %343, %344 : vector<8x128xf32>
    %cst_170 = arith.constant 0.000000e+00 : f32
    %346 = vector.broadcast %cst_170 : f32 to vector<8x128xf32>
    %347 = arith.maximumf %345, %346 : vector<8x128xf32>
    %348 = arith.truncf %347 : vector<8x128xf32> to vector<8x128xbf16>
    %c0_171 = arith.constant 0 : index
    %c0_172 = arith.constant 0 : index
    %349 = vector.load %arg12[%c0_171, %c0_172] : memref<128x128xbf16, #tpu.memory_space<vmem>>, vector<128x128xbf16>
    %cst_173 = arith.constant dense<0.000000e+00> : vector<8x128xf32>
    %350 = tpu.matmul %348, %349, %cst_173 {dimension_numbers = #tpu.dot_dimension_numbers<[1], [0], [0], [1], [0, 0, 1, 1], [], []>} : vector<8x128xbf16>, vector<128x128xbf16>, vector<8x128xf32> -> vector<8x128xf32>
    %351 = arith.addf %342, %350 : vector<8x128xf32>
    %352 = vector.broadcast %316 : vector<1x128xf32> to vector<8x128xf32>
    %353 = arith.addf %351, %352 : vector<8x128xf32>
    %c0_174 = arith.constant 0 : index
    %c0_175 = arith.constant 0 : index
    %354 = vector.load %arg13[%c0_174, %c0_175] : memref<8x128xf32, #tpu.memory_space<vmem>>, vector<8x128xf32>
    tpu.vector_store %arg13[%c0_174, %c0_175], %353 {strides = array<i32>} : memref<8x128xf32, #tpu.memory_space<vmem>>, vector<8x128xf32>,
    return
  }
  func.func @transform_0(%arg0: i32, %arg1: memref<16xi32, #tpu.memory_space<smem>>) -> (i32, i32) {
    %c0_i32 = arith.constant 0 : i32
    %c0_i32_0 = arith.constant 0 : i32
    %c0_i32_1 = arith.constant 0 : i32
    return %c0_i32, %c0_i32_0 : i32, i32
  }
  func.func @transform_1(%arg0: i32, %arg1: memref<16xi32, #tpu.memory_space<smem>>) -> (i32, i32) {
    %c0_i32 = arith.constant 0 : i32
    %c0_i32_0 = arith.constant 0 : i32
    %c0_i32_1 = arith.constant 0 : i32
    return %c0_i32, %c0_i32_0 : i32, i32
  }
  func.func @transform_2(%arg0: i32, %arg1: memref<16xi32, #tpu.memory_space<smem>>) -> (i32, i32, i32) {
    %c0_i32 = arith.constant 0 : i32
    %c0_i32_0 = arith.constant 0 : i32
    %c0_i32_1 = arith.constant 0 : i32
    %c0_i32_2 = arith.constant 0 : i32
    return %c0_i32, %c0_i32_0, %c0_i32_1 : i32, i32, i32
  }
  func.func @transform_3(%arg0: i32, %arg1: memref<16xi32, #tpu.memory_space<smem>>) -> (i32, i32, i32, i32) {
    %c0_i32 = arith.constant 0 : i32
    %c0_i32_0 = arith.constant 0 : i32
    %c0_i32_1 = arith.constant 0 : i32
    %c0_i32_2 = arith.constant 0 : i32
    %c0_i32_3 = arith.constant 0 : i32
    return %c0_i32, %c0_i32_0, %c0_i32_1, %c0_i32_2 : i32, i32, i32, i32
  }
  func.func @transform_4(%arg0: i32, %arg1: memref<16xi32, #tpu.memory_space<smem>>) -> (i32, i32, i32, i32) {
    %c0_i32 = arith.constant 0 : i32
    %c0_i32_0 = arith.constant 0 : i32
    %c0_i32_1 = arith.constant 0 : i32
    %c0_i32_2 = arith.constant 0 : i32
    %c0_i32_3 = arith.constant 0 : i32
    return %c0_i32, %c0_i32_0, %c0_i32_1, %c0_i32_2 : i32, i32, i32, i32
  }
  func.func @transform_5(%arg0: i32, %arg1: memref<16xi32, #tpu.memory_space<smem>>) -> (i32, i32, i32, i32) {
    %c0_i32 = arith.constant 0 : i32
    %c0_i32_0 = arith.constant 0 : i32
    %c0_i32_1 = arith.constant 0 : i32
    %c0_i32_2 = arith.constant 0 : i32
    %c0_i32_3 = arith.constant 0 : i32
    return %c0_i32, %c0_i32_0, %c0_i32_1, %c0_i32_2 : i32, i32, i32, i32
  }
  func.func @transform_6(%arg0: i32, %arg1: memref<16xi32, #tpu.memory_space<smem>>) -> (i32, i32, i32) {
    %c0_i32 = arith.constant 0 : i32
    %c0_i32_0 = arith.constant 0 : i32
    %c0_i32_1 = arith.constant 0 : i32
    %c0_i32_2 = arith.constant 0 : i32
    return %c0_i32, %c0_i32_0, %c0_i32_1 : i32, i32, i32
  }
  func.func @transform_7(%arg0: i32, %arg1: memref<16xi32, #tpu.memory_space<smem>>) -> (i32, i32, i32) {
    %c0_i32 = arith.constant 0 : i32
    %c0_i32_0 = arith.constant 0 : i32
    %c0_i32_1 = arith.constant 0 : i32
    %c0_i32_2 = arith.constant 0 : i32
    return %c0_i32, %c0_i32_0, %c0_i32_1 : i32, i32, i32
  }
  func.func @transform_8(%arg0: i32, %arg1: memref<16xi32, #tpu.memory_space<smem>>) -> (i32, i32) {
    %c0_i32 = arith.constant 0 : i32
    %c0_i32_0 = arith.constant 0 : i32
    %c0_i32_1 = arith.constant 0 : i32
    return %c0_i32, %c0_i32_0 : i32, i32
  }
  func.func @transform_9(%arg0: i32, %arg1: memref<16xi32, #tpu.memory_space<smem>>) -> (i32, i32) {
    %c0_i32 = arith.constant 0 : i32
    %c0_i32_0 = arith.constant 0 : i32
    %c0_i32_1 = arith.constant 0 : i32
    return %c0_i32, %c0_i32_0 : i32, i32
  }
  func.func @transform_10(%arg0: i32, %arg1: memref<16xi32, #tpu.memory_space<smem>>) -> (i32, i32) {
    %c0_i32 = arith.constant 0 : i32
    %c0_i32_0 = arith.constant 0 : i32
    %c0_i32_1 = arith.constant 0 : i32
    return %c0_i32, %c0_i32_0 : i32, i32
  }
  func.func @transform_11(%arg0: i32, %arg1: memref<16xi32, #tpu.memory_space<smem>>) -> (i32, i32) {
    %c0_i32 = arith.constant 0 : i32
    %c0_i32_0 = arith.constant 0 : i32
    return %arg0, %c0_i32 : i32, i32
  }
}

</mosaic_0001>

<bundles_post_ra>
// kernel: forward.1
= control target key start
LH: loop header
LB: loop body
LE: loop exit
PB: predicated region body
PF: predicated region fallthrough
CT: control target
= control target key end

     0   :  { %s5883_s0 = inlined_call_operand.vmem [shape: s32[16], index: 0, kind: input, shape index: {}]   ;;  %s5884_s1 = inlined_call_operand.vmem [shape: f32[64,32], index: 1, kind: input, shape index: {}]   ;;  %s5885_s2 = inlined_call_operand.vmem [shape: f32[8,32], index: 2, kind: input, shape index: {}]   ;;  %s5886_s3 = inlined_call_operand.vmem [shape: f32[2,7,128], index: 3, kind: input, shape index: {}]   ;;  %s5887_s4 = inlined_call_operand.vmem [shape: f32[2,12,1,8], index: 4, kind: input, shape index: {}]   ;;  %s5888_s5 = inlined_call_operand.vmem [shape: bf16[2,12,32,8], index: 5, kind: input, shape index: {}]   ;;  %s5889_s6 = inlined_call_operand.vmem [shape: bf16[2,4,8,32], index: 6, kind: input, shape index: {}]   ;;  %s5890_s7 = inlined_call_operand.vmem [shape: bf16[2,32,128], index: 7, kind: input, shape index: {}]   ;;  %s5891_s8 = inlined_call_operand.vmem [shape: bf16[2,128,32], index: 8, kind: input, shape index: {}]   ;;  %s5892_s9 = inlined_call_operand.vmem [shape: f32[4,128], index: 9, kind: input, shape index: {}]   ;;  %s5893_s10 = inlined_call_operand.vmem [shape: bf16[32,256], index: 10, kind: input, shape index: {}]   ;;  %s5894_s11 = inlined_call_operand.vmem [shape: bf16[128,128], index: 11, kind: input, shape index: {}]   ;;  %s5895_s12 = inlined_call_operand.vmem [shape: f32[16,128], index: 12, kind: output, shape index: {}]  }
   0x1   :  { %5899 = sst [smem:[#allocation8_spill]] %s5895_s12  ;;  %s17_s23 = sshll.u32 %s5883_s0, 4  ;;  %s18_s23 = int_to_ptr.vmem [resolvable:$true] %s17_s23 }
   0x2   :  { %s4950_s24 = scalar_lea.vmem %s18_s23, 16  ;;  %p4955_p1 = scmp.lt.s32.totalorder %s18_s23, %s18_s23 }
   0x3   :  { %p4951_p0 = scmp.ne.s32.totalorder %s18_s23, %s4950_s24  ;;  %p4956_p2 = scmp.lt.s32.totalorder %s4950_s24, %s4950_s24 }
   0x5   :  { %p4957_p3 = por %p4956_p2, %p4955_p1 }
   0x7   :  { %p4958_p4 = pnand %p4957_p3, %p4951_p0 }
   0x9   :  { %4961 = shalt.err (!%p4958_p4)  }
   0xa   :  { %s4972_s25 = smov [#allocation4]  }
   0xb   :  { %20 = dma.vmem_to_smem %s18_s23, 16, %s4972_s25, [#allocation3] }
   0xc   :  { %4966 = dma.done.wait [#allocation3], 16 }
   0xd   :  { %4967 = vsyncadd [#allocation3], 4294967280 }
   0xe   :  { %22 = sfence }
   0xf   :  { %s5044_s26 = smov 0  }
  0x10 LB: > { %5900 = sst [smem:[#allocation6_spill]] %s4970_s26  ;;  %s5050_s0 = sadd.s32 4294967295, %s4970_s26   ;;  %s4970_s26 = sphi %s5044_s26, %s28_s26  }
  0x11   : > { %5901 = sst [smem:[#allocation7_spill]] %s5050_s0  ;;  %p3976_p5 = scmp.ge.s32.totalorder %s4970_s26, 1 }
  0x12   : > { %p334_p6 = scmp.lt.s32.totalorder %s4970_s26, 3 }
  0x14   : > { %p335_p7 = pnand %p3976_p5, %p334_p6 }
  0x15   : > { %s3978_s27 = sshll.u32 (!%p335_p7), %s5050_s0, 3  ;;  %vm377_vm0 = vcmask (!%p335_p7), 253952   ;;  %v415_v8 = vld [vmem:[%s5885_s2] sm:$0xff] (!%p335_p7)  ;;  %vm429_vm1 = vcmask (!%p335_p7), 261120   ;;  %v4823_v18 = vld [vmem:[%s5888_s5 + $0x10] sm:$0xff] (!%p335_p7)   ;;  %v4973_v19 = vmov (!%p335_p7), 0.0  }
  0x16   : > { %338 = sbr.rel (%p335_p7) target bundleno = 5421 (0x152d), region = 64  ;;  %s374_s28 = sld [smem:[#allocation4 + %s3978_s27]] (!%p335_p7)  ;;  %v4822_v17 = vld [vmem:[%s5888_s5] sm:$0xff] (!%p335_p7)   ;;  %4398 = vmatprep.subr.bf16.mxu0 (!%p335_p7), %v4973_v19  ;;  %4406 = vmatprep.subr.bf16.mxu1 (!%p335_p7), %v4973_v19  ;;  %v4824_v20 = vld [vmem:[%s5888_s5 + $0x8] sm:$0xff] (!%p335_p7)   ;;  %v4825_v21 = vld [vmem:[%s5888_s5 + $0x18] sm:$0xff] (!%p335_p7)   ;;  %vm4974_vm2 = vmmov (!%p335_p7), 0  }
  0x17   : > { %s379_s29 = sadd.s32 (!%p335_p7), 1, %s3978_s27  ;;  %s384_s13 = sadd.s32 (!%p335_p7), 2, %s3978_s27  ;;  %4399 = vmatpush3.bf16.msra.mxu0 (!%p335_p7), %v4822_v17  ;;  %4407 = vmatpush3.bf16.msra.mxu1 (!%p335_p7), %v4823_v18  ;;  %v3979_v26 = vld [vmem:[%s5886_s3] ss:$0 sm:$0xff] (!%p335_p7)  ;;  %v3980_v28 = vld [vmem:[%s5886_s3 + $0x1] ss:$0 sm:$0xff] (!%p335_p7) }
  0x18   : > { %s380_s30 = sld [smem:[#allocation4 + %s379_s29]] (!%p335_p7)  ;;  %s389_s15 = sadd.s32 (!%p335_p7), 3, %s3978_s27  ;;  %4400 = vmatprep.subr.bf16.mxu0 (!%p335_p7), %v4973_v19  ;;  %4408 = vmatprep.subr.bf16.mxu1 (!%p335_p7), %v4973_v19  ;;  %v4826_v31 = vld [vmem:[%s5888_s5 + $0x20] sm:$0xff] (!%p335_p7)   ;;  %v4827_v32 = vld [vmem:[%s5888_s5 + $0x30] sm:$0xff] (!%p335_p7)   ;;  %v4828_v34 = vld [vmem:[%s5888_s5 + $0x28] sm:$0xff] (!%p335_p7)   ;;  %vm1226_vm3 = vcmask (!%p335_p7), 64512  }
  0x19   : > { %s385_s14 = sld [smem:[#allocation4 + %s384_s13]] (!%p335_p7)  ;;  %s394_s17 = sadd.s32 (!%p335_p7), 4, %s3978_s27  ;;  %4402 = vmatprep.mubr.msk.bf16.mxu0 (!%p335_p7), %vm4974_vm2, %v4973_v19  ;;  %4410 = vmatprep.mubr.msk.bf16.mxu1 (!%p335_p7), %vm4974_vm2, %v4973_v19  ;;  %v4829_v35 = vld [vmem:[%s5888_s5 + $0x38] sm:$0xff] (!%p335_p7)   ;;  %v4830_v36 = vld [vmem:[%s5888_s5 + $0x40] sm:$0xff] (!%p335_p7)   ;;  %v4831_v37 = vld [vmem:[%s5888_s5 + $0x50] sm:$0xff] (!%p335_p7)   ;;  %vm1472_vm4 = vcmask (!%p335_p7), 1043456  }
  0x1a   : > { %s390_s16 = sld [smem:[#allocation4 + %s389_s15]] (!%p335_p7)  ;;  %s399_s19 = sadd.s32 (!%p335_p7), 5, %s3978_s27  ;;  %v4832_v38 = vld [vmem:[%s5888_s5 + $0x48] sm:$0xff] (!%p335_p7)   ;;  %v4833_v39 = vld [vmem:[%s5888_s5 + $0x58] sm:$0xff] (!%p335_p7)   ;;  %v4834_v40 = vld [vmem:[%s5888_s5 + $0x60] sm:$0xff] (!%p335_p7)  }
  0x1b   : > { %s395_s18 = sld [smem:[#allocation4 + %s394_s17]] (!%p335_p7)  ;;  %s404_s21 = sadd.s32 (!%p335_p7), 6, %s3978_s27  ;;  %4401 = vmatpush3.bf16.msra.mxu0 (!%p335_p7), %v4824_v20  ;;  %4409 = vmatpush3.bf16.msra.mxu1 (!%p335_p7), %v4825_v21  ;;  %v4835_v41 = vld [vmem:[%s5888_s5 + $0x70] sm:$0xff] (!%p335_p7)   ;;  %v4836_v42 = vld [vmem:[%s5888_s5 + $0x68] sm:$0xff] (!%p335_p7)   ;;  %v4837_v43 = vld [vmem:[%s5888_s5 + $0x78] sm:$0xff] (!%p335_p7)  }
  0x1c   : > { %s400_s20 = sld [smem:[#allocation4 + %s399_s19]] (!%p335_p7)  ;;  %s375_s24 = scalar_lea.vmem (!%p335_p7), %s5884_s1, %s374_s28  ;;  %4414 = vmatprep.subr.bf16.mxu0 (!%p335_p7), %v4973_v19  ;;  %4422 = vmatprep.subr.bf16.mxu1 (!%p335_p7), %v4973_v19  ;;  %v4838_v44 = vld [vmem:[%s5888_s5 + $0x80] sm:$0xff] (!%p335_p7)   ;;  %v4839_v45 = vld [vmem:[%s5888_s5 + $0x90] sm:$0xff] (!%p335_p7)   ;;  %v4840_v46 = vld [vmem:[%s5888_s5 + $0x88] sm:$0xff] (!%p335_p7)  }
  0x1d   : > { %s405_s25 = sld [smem:[#allocation4 + %s404_s21]]  ;;  %v376_v0 = vld [vmem:[%s375_s24] sm:$0x1]  ;;  %s409_s29 = sadd.s32 7, %s3978_s27  ;;  %v4841_v47 = vld [vmem:[%s5888_s5 + $0x98] sm:$0xff]   ;;  %v4843_v49 = vld [vmem:[%s5888_s5 + $0xb0] sm:$0xff]  }
  0x1e   : > { %s381_s0 = scalar_lea.vmem %s5884_s1, %s380_s30  ;;  %378 = vst.msk [vmem:[#allocation2] sm:$0x1] %vm377_vm0, %v376_v0  ;;  %s410_s19 = sld [smem:[#allocation4 + %s409_s29]]  ;;  %v4842_v48 = vld [vmem:[%s5888_s5 + $0xa0] sm:$0xff]   ;;  %v4844_v50 = vld [vmem:[%s5888_s5 + $0xa8] sm:$0xff]   ;;  %v4845_v51 = vld [vmem:[%s5888_s5 + $0xb8] sm:$0xff]  }
  0x1f   : > { %v382_v1 = vld [vmem:[%s381_s0] sm:$0x1]  ;;  %s386_s17 = scalar_lea.vmem %s5884_s1, %s385_s14  ;;  %v3982_v21 = vld [vmem:[%s5887_s4 + $0x1] ss:$0 sm:$0xff]  ;;  %s5904_s23 = sld [smem:[#allocation7_spill]] }
  0x20   : > { %383 = vst.msk [vmem:[#allocation2 + $0x1] sm:$0x1] %vm377_vm0, %v382_v1  ;;  %v387_v2 = vld [vmem:[%s386_s17] sm:$0x1]  ;;  %s391_s21 = scalar_lea.vmem %s5884_s1, %s390_s16  ;;  %s5905_s28 = sld [smem:[#allocation8_spill]] }
  0x21   : > { %388 = vst.msk [vmem:[#allocation2 + $0x2] sm:$0x1] %vm377_vm0, %v387_v2  ;;  %v392_v3 = vld [vmem:[%s391_s21] sm:$0x1]  ;;  %s396_s27 = scalar_lea.vmem %s5884_s1, %s395_s18 }
  0x22   : > { %393 = vst.msk [vmem:[#allocation2 + $0x3] sm:$0x1] %vm377_vm0, %v392_v3  ;;  %v397_v4 = vld [vmem:[%s396_s27] sm:$0x1]  ;;  %s401_s14 = scalar_lea.vmem %s5884_s1, %s400_s20 }
  0x23   : > { %398 = vst.msk [vmem:[#allocation2 + $0x4] sm:$0x1] %vm377_vm0, %v397_v4  ;;  %v402_v5 = vld [vmem:[%s401_s14] sm:$0x1]  ;;  %s406_s16 = scalar_lea.vmem %s5884_s1, %s405_s25  ;;  %v3985_v4 = vld [vmem:[%s5887_s4 + $0x4] ss:$0 sm:$0xff] }
  0x24   : > { %403 = vst.msk [vmem:[#allocation2 + $0x5] sm:$0x1] %vm377_vm0, %v402_v5  ;;  %v407_v6 = vld [vmem:[%s406_s16] sm:$0x1]  ;;  %s411_s13 = scalar_lea.vmem %s5884_s1, %s410_s19  ;;  %v3986_v5 = vld [vmem:[%s5887_s4 + $0x5] ss:$0 sm:$0xff] }
  0x25   : > { %408 = vst.msk [vmem:[#allocation2 + $0x6] sm:$0x1] %vm377_vm0, %v407_v6  ;;  %v412_v7 = vld [vmem:[%s411_s13] sm:$0x1]  ;;  %p368_p8 = scmp.lt.s32.totalorder %s5904_s23, 1 }
  0x26   : > { %413 = vst.msk [vmem:[#allocation2 + $0x7] sm:$0x1] %vm377_vm0, %v412_v7  ;;  %v3981_v20 = vld [vmem:[%s5887_s4] ss:$0 sm:$0xff] }
  0x27   : > { %s5908_s23 = smov (!%p368_p8, %s5904_s23), 1 }
  0x28   : > { %s3977_s15 = sshll.u32 %s5908_s23, 3 }
  0x29   : > { %s371_s21 = scalar_lea.vmem %s5905_s28, %s3977_s15 }
  0x2d   : > { %v414_v9 = vld [vmem:[#allocation2] sm:$0xff] }
  0x2e   : > { %v5090_v10 = vadd.f32 %v415_v8, %v414_v9 }
  0x30   : > { %v430_v11 = vsel %vm429_vm1, %v5090_v10, 0.0 }
  0x31   : > { %431 = vadd.xlane.f32.xlu0 %v430_v11 }
  0xbe   : > { %v432_v12 = vpop.xlane.xlu0 %431 }
  0xbf   : > { %v434_v13 = vmul.f32 0.03125, %v432_v12 }
  0xc1   : > { %v435_v14 = vsub.f32 %v5090_v10, %v434_v13 }
  0xc3   : > { %v436_v15 = vmul.f32 %v435_v14, %v435_v14 }
  0xc5   : > { %v437_v16 = vsel %vm429_vm1, %v436_v15, 0.0 }
  0xc6   : > { %438 = vadd.xlane.f32.xlu0 %v437_v16 }
 0x153   : > { %v439_v22 = vpop.xlane.xlu0 %438 }
 0x154   : > { %v440_v23 = vmul.f32 0.03125, %v439_v22 }
 0x156   : > { %v441_v24 = vadd.f32 1e-05, %v440_v23 }
 0x158   : > { %4904 = vrsqrt.f32 %v441_v24  ;;  %v3987_v24 = vld [vmem:[%s5887_s4 + $0x6] ss:$0 sm:$0xff] }
 0x162   : > { %v4905_v25 = vpop.eup %4904 }
 0x163   : > { %v443_v27 = vmul.f32 %v4905_v25, %v435_v14  ;;  %v3988_v25 = vld [vmem:[%s5887_s4 + $0x7] ss:$0 sm:$0xff] }
 0x165   : > { %v448_v29 = vmul.f32 %v3979_v26, %v443_v27 }
 0x167   : > { %v453_v30 = vadd.f32 %v3980_v28, %v448_v29 }
 0x169   : > { %v5130_v33 = vpack.c.bf16 %v453_v30, %v453_v30 }
 0x16b   : > { %4403 = vmatmul.mubr.msk.bf16.vlgmr.msra.gmra.mrb[0].mxu0 %vm429_vm1, %v5130_v33  ;;  %4411 = vmatmul.mubr.msk.bf16.vlgmr.msra.gmra.mrb[0].mxu1 %vm429_vm1, %v5130_v33 }
 0x16c   : > { %4415 = vmatpush3.bf16.msra.mxu0 %v4826_v31  ;;  %4423 = vmatpush3.bf16.msra.mxu1 %v4827_v32 }
 0x16d   : > { %4416 = vmatprep.subr.bf16.mxu0 %v4973_v19  ;;  %4424 = vmatprep.subr.bf16.mxu1 %v4973_v19 }
 0x16e   : > { %4418 = vmatprep.mubr.msk.bf16.mxu0 %vm4974_vm2, %v4973_v19  ;;  %4426 = vmatprep.mubr.msk.bf16.mxu1 %vm4974_vm2, %v4973_v19 }
 0x170   : > { %4417 = vmatpush3.bf16.msra.mxu0 %v4828_v34  ;;  %4425 = vmatpush3.bf16.msra.mxu1 %v4829_v35 }
 0x171   : > { %4430 = vmatprep.subr.bf16.mxu0 %v4973_v19  ;;  %4438 = vmatprep.subr.bf16.mxu1 %v4973_v19 }
 0x173   : > { %4419 = vmatmul.mubr.msk.bf16.vlgmr.msra.gmra.mrb[4].mxu0 %vm429_vm1, %v5130_v33  ;;  %4427 = vmatmul.mubr.msk.bf16.vlgmr.msra.gmra.mrb[4].mxu1 %vm429_vm1, %v5130_v33 }
 0x174   : > { %4431 = vmatpush3.bf16.msra.mxu0 %v4830_v36  ;;  %4439 = vmatpush3.bf16.msra.mxu1 %v4831_v37 }
 0x175   : > { %4432 = vmatprep.subr.bf16.mxu0 %v4973_v19  ;;  %4440 = vmatprep.subr.bf16.mxu1 %v4973_v19 }
 0x176   : > { %4434 = vmatprep.mubr.msk.bf16.mxu0 %vm4974_vm2, %v4973_v19  ;;  %4442 = vmatprep.mubr.msk.bf16.mxu1 %vm4974_vm2, %v4973_v19 }
 0x178   : > { %4433 = vmatpush3.bf16.msra.mxu0 %v4832_v38  ;;  %4441 = vmatpush3.bf16.msra.mxu1 %v4833_v39 }
 0x179   : > { %4446 = vmatprep.subr.bf16.mxu0 %v4973_v19  ;;  %4454 = vmatprep.subr.bf16.mxu1 %v4973_v19 }
 0x17b   : > { %4435 = vmatmul.mubr.msk.bf16.vlgmr.msra.gmra.mrb[8].mxu0 %vm429_vm1, %v5130_v33  ;;  %4443 = vmatmul.mubr.msk.bf16.vlgmr.msra.gmra.mrb[8].mxu1 %vm429_vm1, %v5130_v33 }
 0x17c   : > { %4447 = vmatpush3.bf16.msra.mxu0 %v4834_v40  ;;  %4455 = vmatpush3.bf16.msra.mxu1 %v4835_v41 }
 0x17d   : > { %4448 = vmatprep.subr.bf16.mxu0 %v4973_v19  ;;  %4456 = vmatprep.subr.bf16.mxu1 %v4973_v19 }
 0x17e   : > { %4450 = vmatprep.mubr.msk.bf16.mxu0 %vm4974_vm2, %v4973_v19  ;;  %4458 = vmatprep.mubr.msk.bf16.mxu1 %vm4974_vm2, %v4973_v19 }
 0x180   : > { %4449 = vmatpush3.bf16.msra.mxu0 %v4836_v42  ;;  %4457 = vmatpush3.bf16.msra.mxu1 %v4837_v43  ;;  %v3983_v42 = vld [vmem:[%s5887_s4 + $0x2] ss:$0 sm:$0xff]  ;;  %v3984_v43 = vld [vmem:[%s5887_s4 + $0x3] ss:$0 sm:$0xff] }
 0x181   : > { %4462 = vmatprep.subr.bf16.mxu0 %v4973_v19  ;;  %4470 = vmatprep.subr.bf16.mxu1 %v4973_v19 }
 0x183   : > { %4451 = vmatmul.mubr.msk.bf16.vlgmr.msra.gmra.mrb[12].mxu0 %vm429_vm1, %v5130_v33  ;;  %4459 = vmatmul.mubr.msk.bf16.vlgmr.msra.gmra.mrb[12].mxu1 %vm429_vm1, %v5130_v33 }
 0x184   : > { %4463 = vmatpush3.bf16.msra.mxu0 %v4838_v44  ;;  %4471 = vmatpush3.bf16.msra.mxu1 %v4839_v45 }
 0x185   : > { %4464 = vmatprep.subr.bf16.mxu0 %v4973_v19  ;;  %4472 = vmatprep.subr.bf16.mxu1 %v4973_v19 }
 0x186   : > { %4466 = vmatprep.mubr.msk.bf16.mxu0 %vm4974_vm2, %v4973_v19  ;;  %4474 = vmatprep.mubr.msk.bf16.mxu1 %vm4974_vm2, %v4973_v19 }
 0x188   : > { %4465 = vmatpush3.bf16.msra.mxu0 %v4840_v46  ;;  %4473 = vmatpush3.bf16.msra.mxu1 %v4841_v47  ;;  %v3989_v46 = vld [vmem:[%s5887_s4 + $0x8] ss:$0 sm:$0xff]  ;;  %v3990_v47 = vld [vmem:[%s5887_s4 + $0x9] ss:$0 sm:$0xff] }
 0x189   : > { %4478 = vmatprep.subr.bf16.mxu0 %v4973_v19  ;;  %4486 = vmatprep.subr.bf16.mxu1 %v4973_v19 }
 0x18b   : > { %4467 = vmatmul.mubr.msk.bf16.vlgmr.msra.gmra.mrb[16].mxu0 %vm429_vm1, %v5130_v33  ;;  %4475 = vmatmul.mubr.msk.bf16.vlgmr.msra.gmra.mrb[16].mxu1 %vm429_vm1, %v5130_v33 }
 0x18c   : > { %4479 = vmatpush3.bf16.msra.mxu0 %v4842_v48  ;;  %4487 = vmatpush3.bf16.msra.mxu1 %v4843_v49 }
 0x18d   : > { %4480 = vmatprep.subr.bf16.mxu0 %v4973_v19  ;;  %4488 = vmatprep.subr.bf16.mxu1 %v4973_v19 }
 0x18e   : > { %4482 = vmatprep.mubr.msk.bf16.mxu0 %vm4974_vm2, %v4973_v19  ;;  %4490 = vmatprep.mubr.msk.bf16.mxu1 %vm4974_vm2, %v4973_v19 }
 0x190   : > { %4481 = vmatpush3.bf16.msra.mxu0 %v4844_v50  ;;  %4489 = vmatpush3.bf16.msra.mxu1 %v4845_v51 }
 0x191   : > { %4494 = vmatprep.subr.bf16.mxu0 %v4973_v19  ;;  %4500 = vmatprep.subr.bf16.mxu1 %v4973_v19 }
 0x193   : > { %4483 = vmatmul.mubr.msk.bf16.vlgmr.msra.gmra.mrb[20].mxu0 %vm429_vm1, %v5130_v33  ;;  %4491 = vmatmul.mubr.msk.bf16.vlgmr.msra.gmra.mrb[20].mxu1 %vm429_vm1, %v5130_v33 }
 0x194   : > { %4496 = vmatprep.mubr.msk.bf16.mxu0 %vm4974_vm2, %v4973_v19  ;;  %4502 = vmatprep.mubr.msk.bf16.mxu1 %vm4974_vm2, %v4973_v19 }
 0x23e   : > { %v636_v52 = vpop.f32.mrb[0].mxu0  ;;  %v688_v53 = vpop.f32.mrb[0].mxu1 }
 0x23f   : > { %v4404_v54 = vpop.f32.mrb[1].mxu0  ;;  %v4412_v55 = vpop.f32.mrb[1].mxu1  ;;  %v637_v26 = vadd.f32 %v3981_v20, %v636_v52  ;;  %v689_v27 = vadd.f32 %v3982_v21, %v688_v53 }
 0x240   : > { %v639_v56 = vpop.f32.mrb[2].mxu0  ;;  %v691_v57 = vpop.f32.mrb[2].mxu1 }
 0x241   : > { %v4405_v58 = vpop.f32.mrb[3].mxu0  ;;  %v4413_v59 = vpop.f32.mrb[3].mxu1  ;;  %v1214_v36 = vpack.c.bf16 %v637_v26, %v637_v26  ;;  %v1215_v37 = vpack.c.bf16 %v689_v27, %v689_v27 }
 0x246   : > { %v740_v60 = vpop.f32.mrb[4].mxu0  ;;  %v792_v61 = vpop.f32.mrb[4].mxu1 }
 0x247   : > { %v4420_v62 = vpop.f32.mrb[5].mxu0  ;;  %v4428_v63 = vpop.f32.mrb[5].mxu1  ;;  %v741_v48 = vadd.f32 %v3983_v42, %v740_v60  ;;  %v793_v49 = vadd.f32 %v3984_v43, %v792_v61 }
 0x248   : > { %v743_v0 = vpop.f32.mrb[6].mxu0  ;;  %v795_v1 = vpop.f32.mrb[6].mxu1 }
 0x249   : > { %v4421_v2 = vpop.f32.mrb[7].mxu0  ;;  %v4429_v3 = vpop.f32.mrb[7].mxu1  ;;  %v1216_v58 = vpack.c.bf16 %v741_v48, %v741_v48  ;;  %v1217_v59 = vpack.c.bf16 %v793_v49, %v793_v49 }
 0x24e   : > { %v844_v6 = vpop.f32.mrb[8].mxu0  ;;  %v896_v7 = vpop.f32.mrb[8].mxu1 }
 0x24f   : > { %v845_v8 = vadd.f32 %v3985_v4, %v844_v6  ;;  %v897_v9 = vadd.f32 %v3986_v5, %v896_v7  ;;  %v4436_v11 = vpop.f32.mrb[9].mxu0  ;;  %v4444_v12 = vpop.f32.mrb[9].mxu1 }
 0x250   : > { %v847_v13 = vpop.f32.mrb[10].mxu0  ;;  %v899_v14 = vpop.f32.mrb[10].mxu1  ;;  %v417_v11 = vlaneseq }
 0x251   : > { %v1218_v15 = vpack.c.bf16 %v845_v8, %v845_v8  ;;  %v1219_v16 = vpack.c.bf16 %v897_v9, %v897_v9  ;;  %v4437_v17 = vpop.f32.mrb[11].mxu0  ;;  %v4445_v18 = vpop.f32.mrb[11].mxu1 }
 0x252   : > { %v418_v12 = vshrl.u32 %v417_v11, 7  ;;  %v420_v13 = vand.u32 127, %v417_v11 }
 0x253   : > { %v1231_v22 = vsel %vm1226_vm3, %v1218_v15, 0  ;;  %v1277_v23 = vsel %vm1226_vm3, %v1219_v16, 0 }
 0x254   : > { %4495 = vmatpush3.bf16.xpose.msra.mxu0 %v1231_v22  ;;  %4501 = vmatpush3.bf16.xpose.msra.mxu1 %v1277_v23  ;;  %vm5312_vm5 = vcmp.ge.s32.totalorder %v418_v12, %v420_v13 }
 0x255   : > { %4506 = vmatprep.subr.bf16.mxu0 %v4973_v19  ;;  %4512 = vmatprep.subr.bf16.mxu1 %v4973_v19 }
 0x256   : > { %v948_v28 = vpop.f32.mrb[12].mxu0  ;;  %v1000_v29 = vpop.f32.mrb[12].mxu1 }
 0x257   : > { %v949_v30 = vadd.f32 %v3987_v24, %v948_v28  ;;  %v1001_v31 = vadd.f32 %v3988_v25, %v1000_v29  ;;  %v4452_v32 = vpop.f32.mrb[13].mxu0  ;;  %v4460_v33 = vpop.f32.mrb[13].mxu1 }
 0x258   : > { %v951_v34 = vpop.f32.mrb[14].mxu0  ;;  %v1003_v35 = vpop.f32.mrb[14].mxu1 }
 0x259   : > { %v1220_v38 = vpack.c.bf16 %v949_v30, %v949_v30  ;;  %v1221_v39 = vpack.c.bf16 %v1001_v31, %v1001_v31  ;;  %v4453_v40 = vpop.f32.mrb[15].mxu0  ;;  %v4461_v41 = vpop.f32.mrb[15].mxu1 }
 0x25b   : > { %v1323_v44 = vsel %vm1226_vm3, %v1220_v38, 0  ;;  %v1369_v45 = vsel %vm1226_vm3, %v1221_v39, 0  ;;  %4497 = vmatmul.mubr.msk.bf16.vlgmr.msra.gmra.mrb[24].mxu0 %vm1226_vm3, %v1214_v36  ;;  %4503 = vmatmul.mubr.msk.bf16.vlgmr.msra.gmra.mrb[24].mxu1 %vm1226_vm3, %v1215_v37 }
 0x25c   : > { %4507 = vmatpush3.bf16.xpose.msra.mxu0 %v1323_v44  ;;  %4513 = vmatpush3.bf16.xpose.msra.mxu1 %v1369_v45 }
 0x25d   : > { %4508 = vmatprep.mubr.msk.bf16.mxu0 %vm4974_vm2, %v4973_v19  ;;  %4514 = vmatprep.mubr.msk.bf16.mxu1 %vm4974_vm2, %v4973_v19 }
 0x25e   : > { %v1052_v50 = vpop.f32.mrb[16].mxu0  ;;  %v1104_v51 = vpop.f32.mrb[16].mxu1  ;;  %4518 = vmatprep.subr.bf16.mxu0 %v4973_v19  ;;  %4524 = vmatprep.subr.bf16.mxu1 %v4973_v19 }
 0x25f   : > { %v1053_v52 = vadd.f32 %v3989_v46, %v1052_v50  ;;  %v1105_v53 = vadd.f32 %v3990_v47, %v1104_v51  ;;  %v4468_v54 = vpop.f32.mrb[17].mxu0  ;;  %v4476_v55 = vpop.f32.mrb[17].mxu1 }
 0x260   : > { %v1055_v56 = vpop.f32.mrb[18].mxu0  ;;  %v1107_v57 = vpop.f32.mrb[18].mxu1 }
 0x261   : > { %v1222_v60 = vpack.c.bf16 %v1053_v52, %v1053_v52  ;;  %v1223_v61 = vpack.c.bf16 %v1105_v53, %v1105_v53  ;;  %v4469_v62 = vpop.f32.mrb[19].mxu0  ;;  %v4477_v63 = vpop.f32.mrb[19].mxu1 }
 0x263   : > { %v1474_v0 = vsel %vm1472_vm4, %v1222_v60, 0  ;;  %v1520_v1 = vsel %vm1472_vm4, %v1223_v61, 0  ;;  %4509 = vmatmul.mubr.msk.bf16.vlgmr.msra.gmra.mrb[28].mxu0 %vm1226_vm3, %v1216_v58  ;;  %4515 = vmatmul.mubr.msk.bf16.vlgmr.msra.gmra.mrb[28].mxu1 %vm1226_vm3, %v1217_v59 }
 0x264   : > { %4519 = vmatpush3.bf16.msra.mxu0 %v1474_v0  ;;  %4525 = vmatpush3.bf16.msra.mxu1 %v1520_v1 }
 0x265   : > { %4520 = vmatprep.mubr.msk.bf16.mxu0 %vm4974_vm2, %v4973_v19  ;;  %4530 = vmatprep.subr.bf16.mxu0 %v4973_v19 }
 0x266   : > { %v5305_v2 = vpop.f32.mrb[20].mxu0  ;;  %v5307_v3 = vpop.f32.mrb[20].mxu1  ;;  %4526 = vmatprep.mubr.msk.bf16.mxu1 %vm4974_vm2, %v4973_v19  ;;  %4536 = vmatprep.subr.bf16.mxu1 %v4973_v19 }
 0x267   : > { %v4484_v4 = vpop.f32.mrb[21].mxu0  ;;  %v4492_v5 = vpop.f32.mrb[21].mxu1 }
 0x268   : > { %v1159_v6 = vpop.f32.mrb[22].mxu0  ;;  %v1211_v7 = vpop.f32.mrb[22].mxu1  ;;  %v3991_v4 = vld [vmem:[%s5887_s4 + $0xa] ss:$0 sm:$0xff] }
 0x269   : > { %v4485_v8 = vpop.f32.mrb[23].mxu0  ;;  %v4493_v9 = vpop.f32.mrb[23].mxu1  ;;  %v1157_v5 = vadd.f32 %v3991_v4, %v5305_v2  ;;  %v3992_v7 = vld [vmem:[%s5887_s4 + $0xb] ss:$0 sm:$0xff] }
 0x26a   : > { %v1209_v12 = vadd.f32 %v3992_v7, %v5307_v3 }
 0x26b   : > { %v1224_v11 = vpack.c.bf16 %v1157_v5, %v1157_v5 }
 0x32e   : > { %v1267_v14 = vpop.f32.mrb[24].mxu0  ;;  %v1313_v15 = vpop.f32.mrb[24].mxu1 }
 0x32f   : > { %v1411_v17 = vmul.f32 0.35355338, %v1267_v14  ;;  %v1412_v18 = vmul.f32 0.35355338, %v1313_v15  ;;  %v4498_v20 = vpop.f32.mrb[25].mxu0  ;;  %v4504_v21 = vpop.f32.mrb[25].mxu1 }
 0x330   : > { %v1270_v22 = vpop.f32.mrb[26].mxu0  ;;  %v1316_v23 = vpop.f32.mrb[26].mxu1 }
 0x331   : > { %v4499_v24 = vpop.f32.mrb[27].mxu0  ;;  %v4505_v25 = vpop.f32.mrb[27].mxu1  ;;  %v1417_v26 = vsel %vm5312_vm5, %v1411_v17, -1e+30  ;;  %v1418_v28 = vsel %vm5312_vm5, %v1412_v18, -1e+30  ;;  %v1225_v18 = vpack.c.bf16 %v1209_v12, %v1209_v12 }
 0x332   : > { %v1421_v27 = vsel %vm1226_vm3, %v1417_v26, -inf  ;;  %v1424_v31 = vsel %vm1226_vm3, %v1418_v28, -inf  ;;  %v1566_v17 = vsel %vm1472_vm4, %v1224_v11, 0  ;;  %v1658_v23 = vld [vmem:[%s5889_s6] sm:$0xf] }
 0x333   : > { %1422 = vmax.xlane.f32.xlu1 %v1421_v27  ;;  %v1612_v3 = vsel %vm1472_vm4, %v1225_v18, 0  ;;  %v1666_v27 = vsel %vm1472_vm4, %v1658_v23, 0  ;;  %v4041_v18 = vld [vmem:[%s5886_s3 + $0x4] ss:$0 sm:$0xff] }
 0x336   : > { %v1359_v29 = vpop.f32.mrb[28].mxu0  ;;  %v1405_v30 = vpop.f32.mrb[28].mxu1 }
 0x337   : > { %v1413_v32 = vmul.f32 0.35355338, %v1359_v29  ;;  %v1414_v33 = vmul.f32 0.35355338, %v1405_v30  ;;  %v4516_v34 = vpop.f32.mrb[29].mxu1  ;;  %1425 = vmax.xlane.f32.xlu1 %v1424_v31  ;;  %v4510_v35 = vpop.f32.mrb[29].mxu0 }
 0x338   : > { %v1362_v36 = vpop.f32.mrb[30].mxu0  ;;  %v1408_v37 = vpop.f32.mrb[30].mxu1  ;;  %v1659_v29 = vld [vmem:[%s5889_s6 + $0x4] sm:$0xf]  ;;  %v1660_v31 = vld [vmem:[%s5889_s6 + $0x8] sm:$0xf] }
 0x339   : > { %v4511_v38 = vpop.f32.mrb[31].mxu0  ;;  %v4517_v39 = vpop.f32.mrb[31].mxu1  ;;  %v1420_v40 = vsel %vm5312_vm5, %v1414_v33, -1e+30  ;;  %v1419_v41 = vsel %vm5312_vm5, %v1413_v32, -1e+30 }
 0x33a   : > { %v1430_v42 = vsel %vm1226_vm3, %v1420_v40, -inf  ;;  %v1427_v43 = vsel %vm1226_vm3, %v1419_v41, -inf  ;;  %v1712_v30 = vsel %vm1472_vm4, %v1659_v29, 0  ;;  %v1758_v35 = vsel %vm1472_vm4, %v1660_v31, 0  ;;  %v1661_v37 = vld [vmem:[%s5889_s6 + $0xc] sm:$0xf] }
 0x33b   : > { %1431 = vmax.xlane.f32.xlu1 %v1430_v42  ;;  %1428 = vmax.xlane.f32.xlu0 %v1427_v43  ;;  %v1804_v42 = vsel %vm1472_vm4, %v1661_v37, 0  ;;  %v4042_v31 = vld [vmem:[%s5886_s3 + $0x2] ss:$0 sm:$0xff] }
 0x33c   : > { %v4848_v37 = vld [vmem:[%s5891_s8] sm:$0xff]  }
 0x3c0   : > { %v1423_v44 = vpop.xlane.xlu1 %1422 }
 0x3c1   : > { %v1433_v45 = vsub.f32 %v1417_v26, %v1423_v44 }
 0x3c3   : > { %v1437_v46 = vmul.f32 1.442695, %v1433_v45 }
 0x3c4   : > { %v1426_v47 = vpop.xlane.xlu1 %1425 }
 0x3c5   : > { %4906 = vpow2.f32 %v1437_v46  ;;  %v1434_v48 = vsub.f32 %v1418_v28, %v1426_v47 }
 0x3c7   : > { %v1439_v49 = vmul.f32 1.442695, %v1434_v48 }
 0x3c8   : > { %v1432_v50 = vpop.xlane.xlu1 %1431  ;;  %v1429_v51 = vpop.xlane.xlu0 %1428 }
 0x3c9   : > { %4908 = vpow2.f32 %v1439_v49  ;;  %v1436_v52 = vsub.f32 %v1420_v40, %v1432_v50  ;;  %v1435_v53 = vsub.f32 %v1419_v41, %v1429_v51 }
 0x3cb   : > { %v1443_v54 = vmul.f32 1.442695, %v1436_v52  ;;  %v1441_v55 = vmul.f32 1.442695, %v1435_v53 }
 0x3cd   : > { %4910 = vpow2.f32 %v1443_v54 }
 0x3ce   : > { %4912 = vpow2.f32 %v1441_v55 }
 0x3cf   : > { %v4907_v56 = vpop.eup %4906 }
 0x3d0   : > { %v1445_v57 = vsel %vm1226_vm3, %v4907_v56, 0.0 }
 0x3d1   : > { %1446 = vadd.xlane.f32.xlu0 %v1445_v57 }
 0x3d3   : > { %v4909_v58 = vpop.eup %4908 }
 0x3d4   : > { %v1448_v59 = vsel %vm1226_vm3, %v4909_v58, 0.0 }
 0x3d5   : > { %1449 = vadd.xlane.f32.xlu1 %v1448_v59 }
 0x3d7   : > { %v4911_v60 = vpop.eup %4910 }
 0x3d8   : > { %v4913_v61 = vpop.eup %4912  ;;  %v1454_v62 = vsel %vm1226_vm3, %v4911_v60, 0.0 }
 0x3d9   : > { %1455 = vadd.xlane.f32.xlu1 %v1454_v62  ;;  %v1451_v63 = vsel %vm1226_vm3, %v4913_v61, 0.0 }
 0x3da   : > { %1452 = vadd.xlane.f32.xlu0 %v1451_v63 }
 0x45e   : > { %v1447_v0 = vpop.xlane.xlu0 %1446 }
 0x45f   : > { %4914 = vrcp.f32 %v1447_v0 }
 0x462   : > { %v1450_v1 = vpop.xlane.xlu1 %1449 }
 0x463   : > { %4916 = vrcp.f32 %v1450_v1 }
 0x466   : > { %v1456_v6 = vpop.xlane.xlu1 %1455 }
 0x467   : > { %4918 = vrcp.f32 %v1456_v6  ;;  %v1453_v8 = vpop.xlane.xlu0 %1452 }
 0x468   : > { %4920 = vrcp.f32 %v1453_v8 }
 0x469   : > { %v4915_v9 = vpop.eup %4914 }
 0x46a   : > { %v1461_v13 = vmul.f32 %v4915_v9, %v4907_v56 }
 0x46c   : > { %v1465_v14 = vpack.c.bf16 %v1461_v13, %v1461_v13 }
 0x46d   : > { %v4917_v15 = vpop.eup %4916 }
 0x46e   : > { %v1462_v20 = vmul.f32 %v4917_v15, %v4909_v58  ;;  %4521 = vmatmul.mubr.msk.bf16.vlgmr.msra.gmra.mrb[32].mxu0 %vm1226_vm3, %v1465_v14 }
 0x46f   : > { %4531 = vmatpush3.bf16.msra.mxu0 %v1566_v17  ;;  %4532 = vmatprep.mubr.msk.bf16.mxu0 %vm4974_vm2, %v4973_v19 }
 0x470   : > { %v1466_v2 = vpack.c.bf16 %v1462_v20, %v1462_v20  ;;  %4542 = vmatprep.subr.bf16.mxu0 %v4973_v19 }
 0x471   : > { %v4919_v21 = vpop.eup %4918 }
 0x472   : > { %v4921_v22 = vpop.eup %4920  ;;  %4527 = vmatmul.mubr.msk.bf16.vlgmr.msra.gmra.mrb[32].mxu1 %vm1226_vm3, %v1466_v2  ;;  %v1464_v25 = vmul.f32 %v4919_v21, %v4911_v60 }
 0x473   : > { %v1463_v24 = vmul.f32 %v4921_v22, %v4913_v61  ;;  %4537 = vmatpush3.bf16.msra.mxu1 %v1612_v3  ;;  %4538 = vmatprep.mubr.msk.bf16.mxu1 %vm4974_vm2, %v4973_v19 }
 0x474   : > { %4548 = vmatprep.subr.bf16.mxu1 %v4973_v19  ;;  %v1468_v28 = vpack.c.bf16 %v1464_v25, %v1464_v25 }
 0x475   : > { %v1467_v26 = vpack.c.bf16 %v1463_v24, %v1463_v24 }
 0x477   : > { %4533 = vmatmul.mubr.msk.bf16.vlgmr.msra.gmra.mrb[36].mxu0 %vm1226_vm3, %v1467_v26  ;;  %v4846_v26 = vld [vmem:[%s5890_s7] sm:$0xff]  }
 0x478   : > { %4543 = vmatpush3.bf16.msra.mxu0 %v1666_v27  ;;  %4544 = vmatprep.mubr.msk.bf16.mxu0 %vm4974_vm2, %v4973_v19 }
 0x479   : > { %4554 = vmatprep.subr.bf16.mxu0 %v4973_v19 }
 0x47a   : > { %4539 = vmatmul.mubr.msk.bf16.vlgmr.msra.gmra.mrb[36].mxu1 %vm1226_vm3, %v1468_v28 }
 0x47b   : > { %4550 = vmatprep.mubr.msk.bf16.mxu1 %vm4974_vm2, %v4973_v19  ;;  %4549 = vmatpush3.bf16.msra.mxu1 %v1712_v30 }
 0x47c   : > { %4560 = vmatprep.subr.bf16.mxu1 %v4973_v19 }
 0x541   : > { %v1510_v32 = vpop.f32.mrb[32].mxu0 }
 0x542   : > { %v1654_v33 = vpack.c.bf16 %v1510_v32, %v1510_v32  ;;  %v4522_v34 = vpop.f32.mrb[33].mxu0 }
 0x543   : > { %v1513_v36 = vpop.f32.mrb[34].mxu0 }
 0x544   : > { %v4523_v38 = vpop.f32.mrb[35].mxu0  ;;  %4545 = vmatmul.mubr.msk.bf16.vlgmr.msra.gmra.mrb[40].mxu0 %vm1226_vm3, %v1654_v33  ;;  %v4043_v33 = vld [vmem:[%s5886_s3 + $0x3] ss:$0 sm:$0xff] }
 0x545   : > { %v1556_v39 = vpop.f32.mrb[32].mxu1  ;;  %4555 = vmatpush3.bf16.msra.mxu0 %v1758_v35  ;;  %4556 = vmatprep.mubr.msk.bf16.mxu0 %vm4974_vm2, %v4973_v19  ;;  %v4849_v38 = vld [vmem:[%s5891_s8 + $0x8] sm:$0xff]  }
 0x546   : > { %v1655_v40 = vpack.c.bf16 %v1556_v39, %v1556_v39  ;;  %v4528_v41 = vpop.f32.mrb[33].mxu1  ;;  %4566 = vmatprep.subr.bf16.mxu0 %v4973_v19  ;;  %v4850_v39 = vld [vmem:[%s5891_s8 + $0x10] sm:$0xff]  }
 0x547   : > { %v1559_v43 = vpop.f32.mrb[34].mxu1  ;;  %v4852_v41 = vld [vmem:[%s5891_s8 + $0x20] sm:$0xff]  }
 0x548   : > { %v4529_v44 = vpop.f32.mrb[35].mxu1  ;;  %4551 = vmatmul.mubr.msk.bf16.vlgmr.msra.gmra.mrb[40].mxu1 %vm1226_vm3, %v1655_v40  ;;  %v4851_v40 = vld [vmem:[%s5891_s8 + $0x18] sm:$0xff]   ;;  %v4854_v43 = vld [vmem:[%s5891_s8 + $0x30] sm:$0xff]  }
 0x549   : > { %4561 = vmatpush3.bf16.msra.mxu1 %v1804_v42  ;;  %4562 = vmatprep.mubr.msk.bf16.mxu1 %vm4974_vm2, %v4973_v19  ;;  %v4853_v42 = vld [vmem:[%s5891_s8 + $0x28] sm:$0xff]   ;;  %v4855_v44 = vld [vmem:[%s5891_s8 + $0x38] sm:$0xff]  }
 0x54a   : > { %v1602_v45 = vpop.f32.mrb[36].mxu0  ;;  %4574 = vmatprep.subr.bf16.mxu1 %v4973_v19 }
 0x54b   : > { %v1656_v46 = vpack.c.bf16 %v1602_v45, %v1602_v45  ;;  %v4534_v47 = vpop.f32.mrb[37].mxu0  ;;  %v4044_v45 = vld [vmem:[%s5886_s3 + $0x6] ss:$0 sm:$0xff] }
 0x54c   : > { %v1605_v48 = vpop.f32.mrb[38].mxu0 }
 0x54d   : > { %v4535_v49 = vpop.f32.mrb[39].mxu0  ;;  %4557 = vmatmul.mubr.msk.bf16.vlgmr.msra.gmra.mrb[44].mxu0 %vm1226_vm3, %v1656_v46  ;;  %v1648_v50 = vpop.f32.mrb[36].mxu1 }
 0x54e   : > { %v1657_v51 = vpack.c.bf16 %v1648_v50, %v1648_v50  ;;  %v4540_v52 = vpop.f32.mrb[37].mxu1  ;;  %4570 = vmatprep.mubr.msk.bf16.mxu0 %vm4974_vm2, %v4973_v19  ;;  %4567 = vmatpush3.bf16.msra.mxu0 %v4846_v26  ;;  %v4860_v26 = vld [vmem:[%s5888_s5 + $0xd0] sm:$0xff]  }
 0x54f   : > { %v1651_v53 = vpop.f32.mrb[38].mxu1  ;;  %4568 = vmatprep.subr.bf16.mxu0 %v4973_v19 }
 0x550   : > { %v4541_v54 = vpop.f32.mrb[39].mxu1  ;;  %4563 = vmatmul.mubr.msk.bf16.vlgmr.msra.gmra.mrb[44].mxu1 %vm1226_vm3, %v1657_v51 }
 0x551   : > { %4590 = vmatprep.mubr.msk.bf16.mxu1 %vm4974_vm2, %v4973_v19  ;;  %4575 = vmatpush3.bf16.msra.mxu1 %v4848_v37  ;;  %v4871_v37 = vld [vmem:[%s5888_s5 + $0x168] sm:$0xff]  }
 0x552   : > { %4576 = vmatprep.subr.bf16.mxu1 %v4973_v19 }
 0x555   : > { %4577 = vmatpush3.bf16.msra.mxu1 %v4849_v38  ;;  %v4872_v38 = vld [vmem:[%s5888_s5 + $0x110] sm:$0xff]  }
 0x556   : > { %4578 = vmatprep.subr.bf16.mxu1 %v4973_v19 }
 0x559   : > { %4579 = vmatpush3.bf16.msra.mxu1 %v4850_v39  ;;  %v4873_v39 = vld [vmem:[%s5888_s5 + $0x118] sm:$0xff]  }
 0x55a   : > { %4580 = vmatprep.subr.bf16.mxu1 %v4973_v19 }
 0x55d   : > { %4581 = vmatpush3.bf16.msra.mxu1 %v4851_v40  ;;  %v4874_v40 = vld [vmem:[%s5888_s5 + $0x130] sm:$0xff]  }
 0x55e   : > { %4582 = vmatprep.subr.bf16.mxu1 %v4973_v19 }
 0x561   : > { %4583 = vmatpush3.bf16.msra.mxu1 %v4852_v41  ;;  %v4875_v41 = vld [vmem:[%s5888_s5 + $0x138] sm:$0xff]  }
 0x562   : > { %4584 = vmatprep.subr.bf16.mxu1 %v4973_v19 }
 0x565   : > { %4585 = vmatpush3.bf16.msra.mxu1 %v4853_v42  ;;  %v4876_v42 = vld [vmem:[%s5888_s5 + $0x150] sm:$0xff]  }
 0x566   : > { %4586 = vmatprep.subr.bf16.mxu1 %v4973_v19 }
 0x569   : > { %4587 = vmatpush3.bf16.msra.mxu1 %v4854_v43  ;;  %v4877_v43 = vld [vmem:[%s5888_s5 + $0x158] sm:$0xff]  }
 0x56a   : > { %4588 = vmatprep.subr.bf16.mxu1 %v4973_v19 }
 0x56d   : > { %4589 = vmatpush3.bf16.msra.mxu1 %v4855_v44  ;;  %v4878_v44 = vld [vmem:[%s5888_s5 + $0x170] sm:$0xff]  }
 0x56e   : > { %4626 = vmatprep.subr.bf16.mxu1 %v4973_v19 }
 0x617   : > { %v1702_v55 = vpop.f32.mrb[40].mxu0 }
 0x618   : > { %v4546_v56 = vpop.f32.mrb[41].mxu0  ;;  %v1846_v60 = vsel %vm429_vm1, %v1702_v55, 0.0 }
 0x619   : > { %v1705_v57 = vpop.f32.mrb[42].mxu0 }
 0x61a   : > { %v4547_v58 = vpop.f32.mrb[43].mxu0 }
 0x61b   : > { %v1748_v59 = vpop.f32.mrb[40].mxu1 }
 0x61c   : > { %v1847_v61 = vsel %vm429_vm1, %v1748_v59, 0.0  ;;  %v4552_v62 = vpop.f32.mrb[41].mxu1 }
 0x61d   : > { %v1848_v63 = vadd.f32 %v1847_v61, %v1846_v60  ;;  %v1751_v0 = vpop.f32.mrb[42].mxu1  ;;  %v4056_v61 = vld [vmem:[%s5886_s3 + $0x5] ss:$0 sm:$0xff] }
 0x61e   : > { %v4553_v1 = vpop.f32.mrb[43].mxu1 }
 0x620   : > { %v1794_v4 = vpop.f32.mrb[44].mxu0 }
 0x621   : > { %v1849_v5 = vsel %vm429_vm1, %v1794_v4, 0.0  ;;  %v4558_v6 = vpop.f32.mrb[45].mxu0 }
 0x622   : > { %v1850_v7 = vadd.f32 %v1849_v5, %v1848_v63  ;;  %v1797_v8 = vpop.f32.mrb[46].mxu0 }
 0x623   : > { %v4559_v9 = vpop.f32.mrb[47].mxu0  ;;  %v1840_v11 = vpop.f32.mrb[44].mxu1 }
 0x624   : > { %v1851_v12 = vsel %vm429_vm1, %v1840_v11, 0.0  ;;  %v4564_v13 = vpop.f32.mrb[45].mxu1 }
 0x625   : > { %v1852_v14 = vadd.f32 %v1851_v12, %v1850_v7  ;;  %v1843_v15 = vpop.f32.mrb[46].mxu1  ;;  %v4856_v13 = vld [vmem:[%s5888_s5 + $0xc0] sm:$0xff]  }
 0x626   : > { %v4565_v17 = vpop.f32.mrb[47].mxu1  ;;  %v4858_v15 = vld [vmem:[%s5888_s5 + $0xc8] sm:$0xff]  }
 0x627   : > { %v1853_v20 = vadd.f32 %v1852_v14, %v5090_v10  ;;  %v4847_v10 = vld [vmem:[%s5890_s7 + $0x8] sm:$0xff]   ;;  %v4857_v14 = vld [vmem:[%s5888_s5 + $0x100] sm:$0xff]  }
 0x628   : > { %4569 = vmatpush3.bf16.msra.mxu0 %v4847_v10  ;;  %v4859_v17 = vld [vmem:[%s5888_s5 + $0x108] sm:$0xff]   ;;  %v4861_v10 = vld [vmem:[%s5888_s5 + $0x120] sm:$0xff]  }
 0x629   : > { %v5396_v2 = vadd.f32 %v4041_v18, %v1853_v20  ;;  %4594 = vmatprep.subr.bf16.mxu0 %v4973_v19 }
 0x62b   : > { %v1859_v21 = vsel %vm429_vm1, %v5396_v2, 0.0 }
 0x62c   : > { %1860 = vadd.xlane.f32.xlu0 %v1859_v21 }
 0x6b9   : > { %v1861_v22 = vpop.xlane.xlu0 %1860 }
 0x6ba   : > { %v1862_v3 = vmul.f32 0.03125, %v1861_v22  ;;  %v4064_v22 = vld [vmem:[%s5886_s3 + $0x8] ss:$0 sm:$0xff] }
 0x6bc   : > { %v1863_v23 = vsub.f32 %v5396_v2, %v1862_v3 }
 0x6be   : > { %v1864_v24 = vmul.f32 %v1863_v23, %v1863_v23 }
 0x6c0   : > { %v1865_v25 = vsel %vm429_vm1, %v1864_v24, 0.0 }
 0x6c1   : > { %1866 = vadd.xlane.f32.xlu1 %v1865_v25 }
 0x74e   : > { %v1867_v27 = vpop.xlane.xlu1 %1866 }
 0x74f   : > { %v1868_v28 = vmul.f32 0.03125, %v1867_v27 }
 0x751   : > { %v1869_v29 = vadd.f32 1e-05, %v1868_v28  ;;  %v4862_v28 = vld [vmem:[%s5888_s5 + $0xd8] sm:$0xff]  }
 0x753   : > { %4922 = vrsqrt.f32 %v1869_v29  ;;  %v4863_v29 = vld [vmem:[%s5888_s5 + $0x128] sm:$0xff]  }
 0x75d   : > { %v4923_v30 = vpop.eup %4922 }
 0x75e   : > { %v1871_v32 = vmul.f32 %v4923_v30, %v1863_v23  ;;  %v4065_v23 = vld [vmem:[%s5886_s3 + $0x9] ss:$0 sm:$0xff]  ;;  %v4864_v30 = vld [vmem:[%s5888_s5 + $0xe0] sm:$0xff]  }
 0x760   : > { %v1876_v34 = vmul.f32 %v4042_v31, %v1871_v32  ;;  %v4865_v31 = vld [vmem:[%s5888_s5 + $0x140] sm:$0xff]   ;;  %v4866_v32 = vld [vmem:[%s5888_s5 + $0xe8] sm:$0xff]  }
 0x762   : > { %v1881_v35 = vadd.f32 %v4043_v33, %v1876_v34  ;;  %v4867_v33 = vld [vmem:[%s5888_s5 + $0x148] sm:$0xff]   ;;  %v4868_v34 = vld [vmem:[%s5888_s5 + $0xf0] sm:$0xff]  }
 0x764   : > { %v1882_v36 = vpack.c.bf16 %v1881_v35, %v1881_v35  ;;  %v4869_v35 = vld [vmem:[%s5888_s5 + $0x160] sm:$0xff]  }
 0x766   : > { %4571 = vmatmul.mubr.msk.bf16.vlgmr.msra.gmra.mrb[48].mxu0 %vm429_vm1, %v1882_v36  ;;  %v4870_v36 = vld [vmem:[%s5888_s5 + $0xf8] sm:$0xff]  }
 0x767   : > { %4598 = vmatprep.mubr.msk.bf16.mxu0 %vm4974_vm2, %v4973_v19  ;;  %4595 = vmatpush3.bf16.msra.mxu0 %v4856_v13  ;;  %v4128_v13 = vld [vmem:[%s5887_s4 + $0xe] ss:$0 sm:$0xff] }
 0x768   : > { %4596 = vmatprep.subr.bf16.mxu0 %v4973_v19 }
 0x76b   : > { %4597 = vmatpush3.bf16.msra.mxu0 %v4858_v15 }
 0x76c   : > { %4602 = vmatprep.subr.bf16.mxu0 %v4973_v19 }
 0x839   : > { %v1940_v46 = vpop.f32.mrb[48].mxu0 }
 0x83a   : > { %v1941_v47 = vadd.f32 %v4044_v45, %v1940_v46  ;;  %v4572_v48 = vpop.f32.mrb[49].mxu0  ;;  %v4879_v45 = vld [vmem:[%s5888_s5 + $0x178] sm:$0xff]   ;;  %v4130_v46 = vld [vmem:[%s5887_s4 + $0x10] ss:$0 sm:$0xff] }
 0x83b   : > { %v1943_v49 = vpop.f32.mrb[50].mxu0 }
 0x83c   : > { %v1946_v50 = vmul.f32 %v1941_v47, %v1941_v47  ;;  %v4573_v51 = vpop.f32.mrb[51].mxu0 }
 0x83e   : > { %v1947_v52 = vmul.f32 %v1946_v50, %v1941_v47 }
 0x840   : > { %v1948_v53 = vmul.f32 0.044715, %v1947_v52 }
 0x842   : > { %v1949_v54 = vadd.f32 %v1948_v53, %v1941_v47 }
 0x844   : > { %v1950_v55 = vmul.f32 0.7978846, %v1949_v54 }
 0x846   : > { %4924 = vtanh.f32 %v1950_v55 }
 0x850   : > { %v4925_v56 = vpop.eup %4924 }
 0x851   : > { %v1952_v57 = vadd.f32 1.0, %v4925_v56 }
 0x853   : > { %v1953_v58 = vmul.f32 0.5, %v1952_v57  ;;  %v4126_v57 = vld [vmem:[%s5887_s4 + $0xc] ss:$0 sm:$0xff] }
 0x855   : > { %v1954_v59 = vmul.f32 %v1953_v58, %v1941_v47 }
 0x857   : > { %v1955_v60 = vpack.c.bf16 %v1954_v59, %v1954_v59  ;;  %v4132_v59 = vld [vmem:[%s5887_s4 + $0x12] ss:$0 sm:$0xff] }
 0x859   : > { %4591 = vmatmul.mubr.bf16.vlgmr.msra.gmra.mrb[48].mxu1 %v1955_v60 }
 0x85a   : > { %4630 = vmatprep.mubr.msk.bf16.mxu1 %vm4974_vm2, %v4973_v19  ;;  %4627 = vmatpush3.bf16.msra.mxu1 %v4857_v14  ;;  %v4134_v14 = vld [vmem:[%s5887_s4 + $0x14] ss:$0 sm:$0xff] }
 0x85b   : > { %4628 = vmatprep.subr.bf16.mxu1 %v4973_v19 }
 0x85e   : > { %4629 = vmatpush3.bf16.msra.mxu1 %v4859_v17 }
 0x85f   : > { %4642 = vmatprep.subr.bf16.mxu1 %v4973_v19 }
 0x92c   : > { %v2054_v62 = vpop.f32.mrb[48].mxu1 }
 0x92d   : > { %v2060_v63 = vadd.f32 %v2054_v62, %v5396_v2  ;;  %v4592_v0 = vpop.f32.mrb[49].mxu1 }
 0x92e   : > { %v2057_v1 = vpop.f32.mrb[50].mxu1 }
 0x92f   : > { %v5460_v4 = vadd.f32 %v4056_v61, %v2060_v63  ;;  %v4593_v5 = vpop.f32.mrb[51].mxu1 }
 0x931   : > { %v2074_v6 = vsel %vm429_vm1, %v5460_v4, 0.0 }
 0x932   : > { %2075 = vadd.xlane.f32.xlu0 %v2074_v6 }
 0x9bf   : > { %v2076_v7 = vpop.xlane.xlu0 %2075 }
 0x9c0   : > { %v2077_v8 = vmul.f32 0.03125, %v2076_v7 }
 0x9c2   : > { %v2078_v9 = vsub.f32 %v5460_v4, %v2077_v8 }
 0x9c4   : > { %v2079_v11 = vmul.f32 %v2078_v9, %v2078_v9 }
 0x9c6   : > { %v2080_v12 = vsel %vm429_vm1, %v2079_v11, 0.0 }
 0x9c7   : > { %2081 = vadd.xlane.f32.xlu1 %v2080_v12 }
 0xa54   : > { %v2082_v18 = vpop.xlane.xlu1 %2081 }
 0xa55   : > { %v2083_v20 = vmul.f32 0.03125, %v2082_v18 }
 0xa57   : > { %v2084_v2 = vadd.f32 1e-05, %v2083_v20 }
 0xa59   : > { %4926 = vrsqrt.f32 %v2084_v2 }
 0xa63   : > { %v4927_v21 = vpop.eup %4926 }
 0xa64   : > { %v2086_v3 = vmul.f32 %v4927_v21, %v2078_v9 }
 0xa66   : > { %v2091_v24 = vmul.f32 %v4064_v22, %v2086_v3 }
 0xa68   : > { %v2096_v25 = vadd.f32 %v4065_v23, %v2091_v24 }
 0xa6a   : > { %v5494_v27 = vpack.c.bf16 %v2096_v25, %v2096_v25 }
 0xa6c   : > { %4599 = vmatmul.mubr.msk.bf16.vlgmr.msra.gmra.mrb[52].mxu0 %vm429_vm1, %v5494_v27  ;;  %4631 = vmatmul.mubr.msk.bf16.vlgmr.msra.gmra.mrb[52].mxu1 %vm429_vm1, %v5494_v27 }
 0xa6d   : > { %4603 = vmatpush3.bf16.msra.mxu0 %v4860_v26  ;;  %4643 = vmatpush3.bf16.msra.mxu1 %v4861_v10 }
 0xa6e   : > { %4604 = vmatprep.subr.bf16.mxu0 %v4973_v19  ;;  %4644 = vmatprep.subr.bf16.mxu1 %v4973_v19 }
 0xa6f   : > { %4606 = vmatprep.mubr.msk.bf16.mxu0 %vm4974_vm2, %v4973_v19  ;;  %4646 = vmatprep.mubr.msk.bf16.mxu1 %vm4974_vm2, %v4973_v19 }
 0xa71   : > { %4605 = vmatpush3.bf16.msra.mxu0 %v4862_v28  ;;  %4645 = vmatpush3.bf16.msra.mxu1 %v4863_v29 }
 0xa72   : > { %4610 = vmatprep.subr.bf16.mxu0 %v4973_v19  ;;  %4658 = vmatprep.subr.bf16.mxu1 %v4973_v19 }
 0xa74   : > { %4607 = vmatmul.mubr.msk.bf16.vlgmr.msra.gmra.mrb[56].mxu0 %vm429_vm1, %v5494_v27  ;;  %4647 = vmatmul.mubr.msk.bf16.vlgmr.msra.gmra.mrb[56].mxu1 %vm429_vm1, %v5494_v27 }
 0xa75   : > { %4611 = vmatpush3.bf16.msra.mxu0 %v4864_v30  ;;  %4659 = vmatpush3.bf16.msra.mxu1 %v4865_v31 }
 0xa76   : > { %4612 = vmatprep.subr.bf16.mxu0 %v4973_v19  ;;  %4660 = vmatprep.subr.bf16.mxu1 %v4973_v19 }
 0xa77   : > { %4614 = vmatprep.mubr.msk.bf16.mxu0 %vm4974_vm2, %v4973_v19  ;;  %4662 = vmatprep.mubr.msk.bf16.mxu1 %vm4974_vm2, %v4973_v19 }
 0xa79   : > { %4613 = vmatpush3.bf16.msra.mxu0 %v4866_v32  ;;  %4661 = vmatpush3.bf16.msra.mxu1 %v4867_v33 }
 0xa7a   : > { %4618 = vmatprep.subr.bf16.mxu0 %v4973_v19  ;;  %4674 = vmatprep.subr.bf16.mxu1 %v4973_v19 }
 0xa7c   : > { %4615 = vmatmul.mubr.msk.bf16.vlgmr.msra.gmra.mrb[60].mxu0 %vm429_vm1, %v5494_v27  ;;  %4663 = vmatmul.mubr.msk.bf16.vlgmr.msra.gmra.mrb[60].mxu1 %vm429_vm1, %v5494_v27 }
 0xa7d   : > { %4619 = vmatpush3.bf16.msra.mxu0 %v4868_v34  ;;  %4675 = vmatpush3.bf16.msra.mxu1 %v4869_v35  ;;  %v4131_v35 = vld [vmem:[%s5887_s4 + $0x11] ss:$0 sm:$0xff] }
 0xa7e   : > { %4620 = vmatprep.subr.bf16.mxu0 %v4973_v19  ;;  %4676 = vmatprep.subr.bf16.mxu1 %v4973_v19 }
 0xa7f   : > { %4622 = vmatprep.mubr.msk.bf16.mxu0 %vm4974_vm2, %v4973_v19  ;;  %4678 = vmatprep.mubr.msk.bf16.mxu1 %vm4974_vm2, %v4973_v19 }
 0xa81   : > { %4621 = vmatpush3.bf16.msra.mxu0 %v4870_v36  ;;  %4677 = vmatpush3.bf16.msra.mxu1 %v4871_v37 }
 0xa82   : > { %4634 = vmatprep.subr.bf16.mxu0 %v4973_v19  ;;  %4690 = vmatprep.subr.bf16.mxu1 %v4973_v19 }
 0xa84   : > { %4623 = vmatmul.mubr.msk.bf16.vlgmr.msra.gmra.mrb[64].mxu0 %vm429_vm1, %v5494_v27  ;;  %4679 = vmatmul.mubr.msk.bf16.vlgmr.msra.gmra.mrb[64].mxu1 %vm429_vm1, %v5494_v27 }
 0xa85   : > { %4635 = vmatpush3.bf16.msra.mxu0 %v4872_v38  ;;  %4638 = vmatprep.mubr.msk.bf16.mxu0 %vm4974_vm2, %v4973_v19 }
 0xa86   : > { %4636 = vmatprep.subr.bf16.mxu0 %v4973_v19  ;;  %4692 = vmatprep.mubr.msk.bf16.mxu1 %vm4974_vm2, %v4973_v19 }
 0xa89   : > { %4637 = vmatpush3.bf16.msra.mxu0 %v4873_v39 }
 0xa8a   : > { %4650 = vmatprep.subr.bf16.mxu0 %v4973_v19 }
 0xa8c   : > { %4639 = vmatmul.mubr.msk.bf16.vlgmr.msra.gmra.mrb[68].mxu0 %vm429_vm1, %v5494_v27 }
 0xa8d   : > { %4651 = vmatpush3.bf16.msra.mxu0 %v4874_v40  ;;  %4654 = vmatprep.mubr.msk.bf16.mxu0 %vm4974_vm2, %v4973_v19 }
 0xa8e   : > { %4652 = vmatprep.subr.bf16.mxu0 %v4973_v19 }
 0xa91   : > { %4653 = vmatpush3.bf16.msra.mxu0 %v4875_v41 }
 0xa92   : > { %4666 = vmatprep.subr.bf16.mxu0 %v4973_v19 }
 0xa94   : > { %4655 = vmatmul.mubr.msk.bf16.vlgmr.msra.gmra.mrb[72].mxu0 %vm429_vm1, %v5494_v27 }
 0xa95   : > { %4667 = vmatpush3.bf16.msra.mxu0 %v4876_v42  ;;  %4670 = vmatprep.mubr.msk.bf16.mxu0 %vm4974_vm2, %v4973_v19  ;;  %v4127_v42 = vld [vmem:[%s5887_s4 + $0xd] ss:$0 sm:$0xff] }
 0xa96   : > { %4668 = vmatprep.subr.bf16.mxu0 %v4973_v19 }
 0xa99   : > { %4669 = vmatpush3.bf16.msra.mxu0 %v4877_v43 }
 0xa9a   : > { %4682 = vmatprep.subr.bf16.mxu0 %v4973_v19 }
 0xa9c   : > { %4671 = vmatmul.mubr.msk.bf16.vlgmr.msra.gmra.mrb[76].mxu0 %vm429_vm1, %v5494_v27 }
 0xa9d   : > { %4683 = vmatpush3.bf16.msra.mxu0 %v4878_v44  ;;  %4686 = vmatprep.mubr.msk.bf16.mxu0 %vm4974_vm2, %v4973_v19  ;;  %v4133_v44 = vld [vmem:[%s5887_s4 + $0x13] ss:$0 sm:$0xff] }
 0xa9e   : > { %4684 = vmatprep.subr.bf16.mxu0 %v4973_v19 }
 0xaa1   : > { %4685 = vmatpush3.bf16.msra.mxu0 %v4879_v45 }
 0xaa2   : > { %4696 = vmatprep.subr.bf16.mxu0 %v4973_v19 }
 0xaa4   : > { %4687 = vmatmul.mubr.msk.bf16.vlgmr.msra.gmra.mrb[80].mxu0 %vm429_vm1, %v5494_v27 }
 0xaa5   : > { %4698 = vmatprep.mubr.msk.bf16.mxu0 %vm4974_vm2, %v4973_v19 }
 0xb3f   : > { %v2281_v47 = vpop.f32.mrb[52].mxu0  ;;  %v2489_v48 = vpop.f32.mrb[52].mxu1 }
 0xb40   : > { %v2490_v49 = vadd.f32 %v4130_v46, %v2489_v48  ;;  %v4600_v50 = vpop.f32.mrb[53].mxu0  ;;  %v4632_v51 = vpop.f32.mrb[53].mxu1  ;;  %v2282_v60 = vadd.f32 %v4126_v57, %v2281_v47 }
 0xb41   : > { %v2284_v52 = vpop.f32.mrb[54].mxu0  ;;  %v2492_v53 = vpop.f32.mrb[54].mxu1 }
 0xb42   : > { %v2863_v54 = vpack.c.bf16 %v2490_v49, %v2490_v49  ;;  %v4601_v55 = vpop.f32.mrb[55].mxu0  ;;  %v4633_v56 = vpop.f32.mrb[55].mxu1  ;;  %v2859_v7 = vpack.c.bf16 %v2282_v60, %v2282_v60  ;;  %v4129_v53 = vld [vmem:[%s5887_s4 + $0xf] ss:$0 sm:$0xff] }
 0xb43   : > { %v4135_v55 = vld [vmem:[%s5887_s4 + $0x15] ss:$0 sm:$0xff] }
 0xb44   : > { %v2875_v58 = vsel %vm1226_vm3, %v2863_v54, 0 }
 0xb45   : > { %4691 = vmatpush3.bf16.xpose.msra.mxu1 %v2875_v58 }
 0xb46   : > { %4702 = vmatprep.subr.bf16.mxu1 %v4973_v19 }
 0xb47   : > { %v2333_v61 = vpop.f32.mrb[56].mxu0  ;;  %v2593_v62 = vpop.f32.mrb[56].mxu1 }
 0xb48   : > { %v2594_v63 = vadd.f32 %v4132_v59, %v2593_v62  ;;  %v4608_v0 = vpop.f32.mrb[57].mxu0  ;;  %v4648_v1 = vpop.f32.mrb[57].mxu1  ;;  %v2334_v45 = vadd.f32 %v4127_v42, %v2333_v61 }
 0xb49   : > { %v2336_v5 = vpop.f32.mrb[58].mxu0  ;;  %v2596_v6 = vpop.f32.mrb[58].mxu1 }
 0xb4a   : > { %v2865_v8 = vpack.c.bf16 %v2594_v63, %v2594_v63  ;;  %v4609_v9 = vpop.f32.mrb[59].mxu0  ;;  %v4649_v11 = vpop.f32.mrb[59].mxu1  ;;  %v2860_v50 = vpack.c.bf16 %v2334_v45, %v2334_v45 }
 0xb4c   : > { %v2967_v12 = vsel %vm1226_vm3, %v2865_v8, 0  ;;  %4693 = vmatmul.mubr.msk.bf16.vlgmr.msra.gmra.mrb[68].mxu1 %vm1226_vm3, %v2859_v7 }
 0xb4d   : > { %4703 = vmatpush3.bf16.xpose.msra.mxu1 %v2967_v12  ;;  %4704 = vmatprep.mubr.msk.bf16.mxu1 %vm4974_vm2, %v4973_v19 }
 0xb4e   : > { %4714 = vmatprep.subr.bf16.mxu1 %v4973_v19 }
 0xb4f   : > { %v2385_v15 = vpop.f32.mrb[60].mxu0  ;;  %v2697_v17 = vpop.f32.mrb[60].mxu1 }
 0xb50   : > { %v2386_v18 = vadd.f32 %v4128_v13, %v2385_v15  ;;  %v2698_v20 = vadd.f32 %v4134_v14, %v2697_v17  ;;  %v4616_v2 = vpop.f32.mrb[61].mxu0  ;;  %v4664_v21 = vpop.f32.mrb[61].mxu1 }
 0xb51   : > { %v2388_v22 = vpop.f32.mrb[62].mxu0  ;;  %v2700_v3 = vpop.f32.mrb[62].mxu1 }
 0xb52   : > { %v2861_v23 = vpack.c.bf16 %v2386_v18, %v2386_v18  ;;  %v2867_v24 = vpack.c.bf16 %v2698_v20, %v2698_v20  ;;  %v4617_v25 = vpop.f32.mrb[63].mxu0  ;;  %v4665_v26 = vpop.f32.mrb[63].mxu1 }
 0xb54   : > { %v3115_v10 = vsel %vm1472_vm4, %v2867_v24, 0  ;;  %4705 = vmatmul.mubr.msk.bf16.vlgmr.msra.gmra.mrb[72].mxu1 %vm1226_vm3, %v2861_v23 }
 0xb55   : > { %4715 = vmatpush3.bf16.msra.mxu1 %v3115_v10  ;;  %4716 = vmatprep.mubr.msk.bf16.mxu1 %vm4974_vm2, %v4973_v19 }
 0xb56   : > { %4726 = vmatprep.subr.bf16.mxu1 %v4973_v19 }
 0xb57   : > { %v2437_v27 = vpop.f32.mrb[64].mxu0  ;;  %v5645_v28 = vpop.f32.mrb[64].mxu1 }
 0xb58   : > { %v4624_v29 = vpop.f32.mrb[65].mxu0  ;;  %v4680_v30 = vpop.f32.mrb[65].mxu1  ;;  %v2438_v56 = vadd.f32 %v4129_v53, %v2437_v27 }
 0xb59   : > { %v2440_v31 = vpop.f32.mrb[66].mxu0  ;;  %v2804_v32 = vpop.f32.mrb[66].mxu1 }
 0xb5a   : > { %v4625_v33 = vpop.f32.mrb[67].mxu0  ;;  %v4681_v34 = vpop.f32.mrb[67].mxu1  ;;  %v2862_v61 = vpack.c.bf16 %v2438_v56, %v2438_v56 }
 0xb5f   : > { %v2541_v36 = vpop.f32.mrb[68].mxu0 }
 0xb60   : > { %v2542_v37 = vadd.f32 %v4131_v35, %v2541_v36  ;;  %v4640_v38 = vpop.f32.mrb[69].mxu0 }
 0xb61   : > { %v2544_v39 = vpop.f32.mrb[70].mxu0 }
 0xb62   : > { %v2864_v40 = vpack.c.bf16 %v2542_v37, %v2542_v37  ;;  %v4641_v41 = vpop.f32.mrb[71].mxu0 }
 0xb64   : > { %v2921_v43 = vsel %vm1226_vm3, %v2864_v40, 0 }
 0xb65   : > { %4697 = vmatpush3.bf16.xpose.msra.mxu0 %v2921_v43 }
 0xb66   : > { %4708 = vmatprep.subr.bf16.mxu0 %v4973_v19 }
 0xb67   : > { %v2645_v46 = vpop.f32.mrb[72].mxu0 }
 0xb68   : > { %v2646_v47 = vadd.f32 %v4133_v44, %v2645_v46  ;;  %v4656_v48 = vpop.f32.mrb[73].mxu0 }
 0xb69   : > { %v2648_v49 = vpop.f32.mrb[74].mxu0 }
 0xb6a   : > { %v2866_v51 = vpack.c.bf16 %v2646_v47, %v2646_v47  ;;  %v4657_v52 = vpop.f32.mrb[75].mxu0 }
 0xb6c   : > { %v3013_v54 = vsel %vm1226_vm3, %v2866_v51, 0  ;;  %4699 = vmatmul.mubr.msk.bf16.vlgmr.msra.gmra.mrb[84].mxu0 %vm1226_vm3, %v2860_v50 }
 0xb6d   : > { %4709 = vmatpush3.bf16.xpose.msra.mxu0 %v3013_v54  ;;  %4710 = vmatprep.mubr.msk.bf16.mxu0 %vm4974_vm2, %v4973_v19 }
 0xb6e   : > { %4720 = vmatprep.subr.bf16.mxu0 %v4973_v19 }
 0xb6f   : > { %v2749_v57 = vpop.f32.mrb[76].mxu0 }
 0xb70   : > { %v2750_v58 = vadd.f32 %v4135_v55, %v2749_v57  ;;  %v4672_v59 = vpop.f32.mrb[77].mxu0  ;;  %v4136_v57 = vld [vmem:[%s5887_s4 + $0x16] ss:$0 sm:$0xff] }
 0xb71   : > { %v2752_v60 = vpop.f32.mrb[78].mxu0 }
 0xb72   : > { %v2868_v62 = vpack.c.bf16 %v2750_v58, %v2750_v58  ;;  %v4673_v63 = vpop.f32.mrb[79].mxu0  ;;  %v2802_v58 = vadd.f32 %v4136_v57, %v5645_v28 }
 0xb74   : > { %v3161_v0 = vsel %vm1472_vm4, %v2868_v62, 0  ;;  %4711 = vmatmul.mubr.msk.bf16.vlgmr.msra.gmra.mrb[88].mxu0 %vm1226_vm3, %v2862_v61  ;;  %v2869_v61 = vpack.c.bf16 %v2802_v58, %v2802_v58 }
 0xb75   : > { %4721 = vmatpush3.bf16.msra.mxu0 %v3161_v0  ;;  %4722 = vmatprep.mubr.msk.bf16.mxu0 %vm4974_vm2, %v4973_v19 }
 0xb76   : > { %4732 = vmatprep.subr.bf16.mxu0 %v4973_v19  ;;  %v3207_v0 = vsel %vm1472_vm4, %v2869_v61, 0 }
 0xb77   : > { %v5674_v1 = vpop.f32.mrb[80].mxu0 }
 0xb78   : > { %v4688_v5 = vpop.f32.mrb[81].mxu0 }
 0xb79   : > { %v2856_v6 = vpop.f32.mrb[82].mxu0 }
 0xb7a   : > { %v4689_v7 = vpop.f32.mrb[83].mxu0 }
 0xc1f   : > { %v2911_v8 = vpop.f32.mrb[68].mxu1 }
 0xc20   : > { %v3055_v9 = vmul.f32 0.35355338, %v2911_v8  ;;  %v4694_v11 = vpop.f32.mrb[69].mxu1  ;;  %v4137_v8 = vld [vmem:[%s5887_s4 + $0x17] ss:$0 sm:$0xff] }
 0xc21   : > { %v2914_v12 = vpop.f32.mrb[70].mxu1 }
 0xc22   : > { %v4695_v13 = vpop.f32.mrb[71].mxu1  ;;  %v3059_v14 = vsel %vm5312_vm5, %v3055_v9, -1e+30  ;;  %v2854_v9 = vadd.f32 %v4137_v8, %v5674_v1  ;;  %v4182_v1 = vld [vmem:[%s5889_s6 + $0x10] sm:$0xf] }
 0xc23   : > { %v3063_v15 = vsel %vm1226_vm3, %v3059_v14, -inf  ;;  %v4190_v8 = vld [vmem:[%s5886_s3 + $0xc] ss:$0 sm:$0xff] }
 0xc24   : > { %3064 = vmax.xlane.f32.xlu0 %v3063_v15  ;;  %v2870_v13 = vpack.c.bf16 %v2854_v9, %v2854_v9 }
 0xc27   : > { %v3003_v17 = vpop.f32.mrb[72].mxu1 }
 0xc28   : > { %v3057_v18 = vmul.f32 0.35355338, %v3003_v17  ;;  %v4706_v20 = vpop.f32.mrb[73].mxu1  ;;  %v3253_v17 = vsel %vm1472_vm4, %v2870_v13, 0 }
 0xc29   : > { %v3006_v2 = vpop.f32.mrb[74].mxu1 }
 0xc2a   : > { %v4707_v21 = vpop.f32.mrb[75].mxu1  ;;  %v3061_v22 = vsel %vm5312_vm5, %v3057_v18, -1e+30 }
 0xc2b   : > { %v3069_v3 = vsel %vm1226_vm3, %v3061_v22, -inf  ;;  %v3308_v21 = vsel %vm1472_vm4, %v4182_v1, 0 }
 0xc2c   : > { %3070 = vmax.xlane.f32.xlu0 %v3069_v3 }
 0xc3f   : > { %v2957_v23 = vpop.f32.mrb[84].mxu0 }
 0xc40   : > { %v3056_v24 = vmul.f32 0.35355338, %v2957_v23  ;;  %v4700_v25 = vpop.f32.mrb[85].mxu0  ;;  %v4184_v23 = vld [vmem:[%s5889_s6 + $0x18] sm:$0xf] }
 0xc41   : > { %v2960_v26 = vpop.f32.mrb[86].mxu0 }
 0xc42   : > { %v4701_v10 = vpop.f32.mrb[87].mxu0  ;;  %v3060_v27 = vsel %vm5312_vm5, %v3056_v24, -1e+30 }
 0xc43   : > { %v3066_v29 = vsel %vm1226_vm3, %v3060_v27, -inf  ;;  %v3400_v10 = vsel %vm1472_vm4, %v4184_v23, 0 }
 0xc44   : > { %3067 = vmax.xlane.f32.xlu1 %v3066_v29 }
 0xc47   : > { %v3049_v30 = vpop.f32.mrb[88].mxu0 }
 0xc48   : > { %v3058_v31 = vmul.f32 0.35355338, %v3049_v30  ;;  %v4712_v32 = vpop.f32.mrb[89].mxu0 }
 0xc49   : > { %v3052_v33 = vpop.f32.mrb[90].mxu0 }
 0xc4a   : > { %v4713_v34 = vpop.f32.mrb[91].mxu0  ;;  %v3062_v35 = vsel %vm5312_vm5, %v3058_v31, -1e+30 }
 0xc4b   : > { %v3072_v36 = vsel %vm1226_vm3, %v3062_v35, -inf }
 0xc4c   : > { %3073 = vmax.xlane.f32.xlu1 %v3072_v36 }
 0xcb1   : > { %v3065_v37 = vpop.xlane.xlu0 %3064 }
 0xcb2   : > { %v3075_v38 = vsub.f32 %v3059_v14, %v3065_v37 }
 0xcb4   : > { %v3079_v39 = vmul.f32 1.442695, %v3075_v38 }
 0xcb6   : > { %4928 = vpow2.f32 %v3079_v39 }
 0xcb9   : > { %v3071_v40 = vpop.xlane.xlu0 %3070 }
 0xcba   : > { %v3077_v41 = vsub.f32 %v3061_v22, %v3071_v40  ;;  %v4183_v22 = vld [vmem:[%s5889_s6 + $0x14] sm:$0xf] }
 0xcbb   : > { %v3354_v3 = vsel %vm1472_vm4, %v4183_v22, 0 }
 0xcbc   : > { %v3083_v42 = vmul.f32 1.442695, %v3077_v41 }
 0xcbe   : > { %4930 = vpow2.f32 %v3083_v42 }
 0xcc0   : > { %v4929_v43 = vpop.eup %4928 }
 0xcc1   : > { %v3087_v44 = vsel %vm1226_vm3, %v4929_v43, 0.0 }
 0xcc2   : > { %3088 = vadd.xlane.f32.xlu0 %v3087_v44 }
 0xcc8   : > { %v4931_v45 = vpop.eup %4930 }
 0xcc9   : > { %v3093_v46 = vsel %vm1226_vm3, %v4931_v45, 0.0 }
 0xcca   : > { %3094 = vadd.xlane.f32.xlu0 %v3093_v46 }
 0xcd1   : > { %v3068_v16 = vpop.xlane.xlu1 %3067 }
 0xcd2   : > { %v3076_v47 = vsub.f32 %v3060_v27, %v3068_v16 }
 0xcd4   : > { %v3081_v48 = vmul.f32 1.442695, %v3076_v47 }
 0xcd6   : > { %4932 = vpow2.f32 %v3081_v48 }
 0xcd9   : > { %v3074_v49 = vpop.xlane.xlu1 %3073 }
 0xcda   : > { %v3078_v50 = vsub.f32 %v3062_v35, %v3074_v49  ;;  %v4185_v35 = vld [vmem:[%s5889_s6 + $0x1c] sm:$0xf] }
 0xcdb   : > { %v3446_v39 = vsel %vm1472_vm4, %v4185_v35, 0  ;;  %v4889_v35 = vld [vmem:[%s5891_s8 + $0x78] sm:$0xff]  }
 0xcdc   : > { %v3085_v51 = vmul.f32 1.442695, %v3078_v50 }
 0xcde   : > { %4934 = vpow2.f32 %v3085_v51 }
 0xce0   : > { %v4933_v52 = vpop.eup %4932 }
 0xce1   : > { %v3090_v53 = vsel %vm1226_vm3, %v4933_v52, 0.0 }
 0xce2   : > { %3091 = vadd.xlane.f32.xlu1 %v3090_v53 }
 0xce8   : > { %v4935_v54 = vpop.eup %4934 }
 0xce9   : > { %v3096_v55 = vsel %vm1226_vm3, %v4935_v54, 0.0 }
 0xcea   : > { %3097 = vadd.xlane.f32.xlu1 %v3096_v55 }
 0xd4f   : > { %v3089_v56 = vpop.xlane.xlu0 %3088 }
 0xd50   : > { %4936 = vrcp.f32 %v3089_v56 }
 0xd57   : > { %v3095_v59 = vpop.xlane.xlu0 %3094 }
 0xd58   : > { %4938 = vrcp.f32 %v3095_v59 }
 0xd5a   : > { %v4937_v60 = vpop.eup %4936 }
 0xd5b   : > { %v3103_v62 = vmul.f32 %v4937_v60, %v4929_v43 }
 0xd5d   : > { %v3107_v63 = vpack.c.bf16 %v3103_v62, %v3103_v62 }
 0xd5f   : > { %4717 = vmatmul.mubr.msk.bf16.vlgmr.msra.gmra.mrb[76].mxu1 %vm1226_vm3, %v3107_v63 }
 0xd60   : > { %4727 = vmatpush3.bf16.msra.mxu1 %v3207_v0  ;;  %4728 = vmatprep.mubr.msk.bf16.mxu1 %vm4974_vm2, %v4973_v19 }
 0xd61   : > { %4738 = vmatprep.subr.bf16.mxu1 %v4973_v19 }
 0xd62   : > { %v4939_v5 = vpop.eup %4938 }
 0xd63   : > { %v3105_v6 = vmul.f32 %v4939_v5, %v4931_v45 }
 0xd65   : > { %v3109_v7 = vpack.c.bf16 %v3105_v6, %v3105_v6 }
 0xd67   : > { %4729 = vmatmul.mubr.msk.bf16.vlgmr.msra.gmra.mrb[80].mxu1 %vm1226_vm3, %v3109_v7 }
 0xd68   : > { %4740 = vmatprep.mubr.msk.bf16.mxu1 %vm4974_vm2, %v4973_v19  ;;  %4739 = vmatpush3.bf16.msra.mxu1 %v3308_v21 }
 0xd69   : > { %4750 = vmatprep.subr.bf16.mxu1 %v4973_v19 }
 0xd6f   : > { %v3092_v28 = vpop.xlane.xlu1 %3091 }
 0xd70   : > { %4940 = vrcp.f32 %v3092_v28 }
 0xd77   : > { %v3098_v11 = vpop.xlane.xlu1 %3097 }
 0xd78   : > { %4942 = vrcp.f32 %v3098_v11 }
 0xd7a   : > { %v4941_v12 = vpop.eup %4940 }
 0xd7b   : > { %v3104_v14 = vmul.f32 %v4941_v12, %v4933_v52 }
 0xd7d   : > { %v3108_v15 = vpack.c.bf16 %v3104_v14, %v3104_v14 }
 0xd7f   : > { %4723 = vmatmul.mubr.msk.bf16.vlgmr.msra.gmra.mrb[92].mxu0 %vm1226_vm3, %v3108_v15 }
 0xd80   : > { %4733 = vmatpush3.bf16.msra.mxu0 %v3253_v17  ;;  %4734 = vmatprep.mubr.msk.bf16.mxu0 %vm4974_vm2, %v4973_v19 }
 0xd81   : > { %4744 = vmatprep.subr.bf16.mxu0 %v4973_v19 }
 0xd82   : > { %v4943_v18 = vpop.eup %4942 }
 0xd83   : > { %v3106_v20 = vmul.f32 %v4943_v18, %v4935_v54 }
 0xd85   : > { %v3110_v2 = vpack.c.bf16 %v3106_v20, %v3106_v20  ;;  %v4880_v20 = vld [vmem:[%s5890_s7 + $0x10] sm:$0xff]  }
 0xd87   : > { %4735 = vmatmul.mubr.msk.bf16.vlgmr.msra.gmra.mrb[96].mxu0 %vm1226_vm3, %v3110_v2 }
 0xd88   : > { %4746 = vmatprep.mubr.msk.bf16.mxu0 %vm4974_vm2, %v4973_v19  ;;  %4745 = vmatpush3.bf16.msra.mxu0 %v3354_v3  ;;  %v4191_v3 = vld [vmem:[%s5886_s3 + $0xa] ss:$0 sm:$0xff] }
 0xd89   : > { %4756 = vmatprep.subr.bf16.mxu0 %v4973_v19 }
 0xe32   : > { %v3151_v24 = vpop.f32.mrb[76].mxu1 }
 0xe33   : > { %v3295_v25 = vpack.c.bf16 %v3151_v24, %v3151_v24  ;;  %v4718_v26 = vpop.f32.mrb[77].mxu1  ;;  %v4192_v24 = vld [vmem:[%s5886_s3 + $0xb] ss:$0 sm:$0xff] }
 0xe34   : > { %v3154_v27 = vpop.f32.mrb[78].mxu1 }
 0xe35   : > { %v4719_v29 = vpop.f32.mrb[79].mxu1  ;;  %4741 = vmatmul.mubr.msk.bf16.vlgmr.msra.gmra.mrb[84].mxu1 %vm1226_vm3, %v3295_v25  ;;  %v4882_v27 = vld [vmem:[%s5891_s8 + $0x40] sm:$0xff]  }
 0xe36   : > { %4751 = vmatpush3.bf16.msra.mxu1 %v3400_v10  ;;  %4752 = vmatprep.mubr.msk.bf16.mxu1 %vm4974_vm2, %v4973_v19  ;;  %v4883_v29 = vld [vmem:[%s5891_s8 + $0x48] sm:$0xff]  }
 0xe37   : > { %4762 = vmatprep.subr.bf16.mxu1 %v4973_v19 }
 0xe3a   : > { %v3243_v30 = vpop.f32.mrb[80].mxu1 }
 0xe3b   : > { %v3297_v31 = vpack.c.bf16 %v3243_v30, %v3243_v30  ;;  %v4730_v32 = vpop.f32.mrb[81].mxu1  ;;  %v4884_v30 = vld [vmem:[%s5891_s8 + $0x50] sm:$0xff]  }
 0xe3c   : > { %v3246_v33 = vpop.f32.mrb[82].mxu1  ;;  %v4886_v32 = vld [vmem:[%s5891_s8 + $0x60] sm:$0xff]  }
 0xe3d   : > { %v4731_v34 = vpop.f32.mrb[83].mxu1  ;;  %4753 = vmatmul.mubr.msk.bf16.vlgmr.msra.gmra.mrb[88].mxu1 %vm1226_vm3, %v3297_v31  ;;  %v4885_v31 = vld [vmem:[%s5891_s8 + $0x58] sm:$0xff]   ;;  %v4887_v33 = vld [vmem:[%s5891_s8 + $0x68] sm:$0xff]  }
 0xe3e   : > { %4766 = vmatprep.mubr.msk.bf16.mxu1 %vm4974_vm2, %v4973_v19  ;;  %4763 = vmatpush3.bf16.msra.mxu1 %v4880_v20  ;;  %v4888_v34 = vld [vmem:[%s5891_s8 + $0x70] sm:$0xff]   ;;  %v4896_v20 = vld [vmem:[%s5894_s11] sm:$0xff]  }
 0xe3f   : > { %4764 = vmatprep.subr.bf16.mxu1 %v4973_v19 }
 0xe52   : > { %v3197_v36 = vpop.f32.mrb[92].mxu0 }
 0xe53   : > { %v3296_v37 = vpack.c.bf16 %v3197_v36, %v3197_v36  ;;  %v4724_v38 = vpop.f32.mrb[93].mxu0  ;;  %v4197_v36 = vld [vmem:[%s5886_s3 + $0xe] ss:$0 sm:$0xff] }
 0xe54   : > { %v3200_v40 = vpop.f32.mrb[94].mxu0 }
 0xe55   : > { %v4725_v41 = vpop.f32.mrb[95].mxu0  ;;  %4747 = vmatmul.mubr.msk.bf16.vlgmr.msra.gmra.mrb[100].mxu0 %vm1226_vm3, %v3296_v37 }
 0xe56   : > { %4757 = vmatpush3.bf16.msra.mxu0 %v3446_v39  ;;  %4758 = vmatprep.mubr.msk.bf16.mxu0 %vm4974_vm2, %v4973_v19 }
 0xe57   : > { %4770 = vmatprep.subr.bf16.mxu0 %v4973_v19 }
 0xe5a   : > { %v3289_v42 = vpop.f32.mrb[96].mxu0 }
 0xe5b   : > { %v3298_v43 = vpack.c.bf16 %v3289_v42, %v3289_v42  ;;  %v4736_v44 = vpop.f32.mrb[97].mxu0 }
 0xe5c   : > { %v3292_v45 = vpop.f32.mrb[98].mxu0 }
 0xe5d   : > { %v4737_v46 = vpop.f32.mrb[99].mxu0  ;;  %4759 = vmatmul.mubr.msk.bf16.vlgmr.msra.gmra.mrb[104].mxu0 %vm1226_vm3, %v3298_v43 }
 0xe5e   : > { %4786 = vmatprep.mubr.msk.bf16.mxu0 %vm4974_vm2, %v4973_v19  ;;  %4771 = vmatpush3.bf16.msra.mxu0 %v4882_v27 }
 0xe5f   : > { %4772 = vmatprep.subr.bf16.mxu0 %v4973_v19 }
 0xe62   : > { %4773 = vmatpush3.bf16.msra.mxu0 %v4883_v29 }
 0xe63   : > { %4774 = vmatprep.subr.bf16.mxu0 %v4973_v19 }
 0xe66   : > { %4775 = vmatpush3.bf16.msra.mxu0 %v4884_v30 }
 0xe67   : > { %4776 = vmatprep.subr.bf16.mxu0 %v4973_v19 }
 0xe6a   : > { %4777 = vmatpush3.bf16.msra.mxu0 %v4885_v31 }
 0xe6b   : > { %4778 = vmatprep.subr.bf16.mxu0 %v4973_v19 }
 0xe6e   : > { %4779 = vmatpush3.bf16.msra.mxu0 %v4886_v32 }
 0xe6f   : > { %4780 = vmatprep.subr.bf16.mxu0 %v4973_v19 }
 0xe72   : > { %4781 = vmatpush3.bf16.msra.mxu0 %v4887_v33 }
 0xe73   : > { %4782 = vmatprep.subr.bf16.mxu0 %v4973_v19 }
 0xe76   : > { %4783 = vmatpush3.bf16.msra.mxu0 %v4888_v34 }
 0xe77   : > { %4784 = vmatprep.subr.bf16.mxu0 %v4973_v19 }
 0xe7a   : > { %4785 = vmatpush3.bf16.msra.mxu0 %v4889_v35 }
 0xf08   : > { %v3344_v16 = vpop.f32.mrb[84].mxu1 }
 0xf09   : > { %v4742_v47 = vpop.f32.mrb[85].mxu1  ;;  %v3488_v55 = vsel %vm429_vm1, %v3344_v16, 0.0 }
 0xf0a   : > { %v3347_v48 = vpop.f32.mrb[86].mxu1 }
 0xf0b   : > { %v4743_v49 = vpop.f32.mrb[87].mxu1 }
 0xf10   : > { %v3436_v50 = vpop.f32.mrb[88].mxu1 }
 0xf11   : > { %v4754_v51 = vpop.f32.mrb[89].mxu1  ;;  %v3491_v60 = vsel %vm429_vm1, %v3436_v50, 0.0 }
 0xf12   : > { %v3439_v52 = vpop.f32.mrb[90].mxu1 }
 0xf13   : > { %v4755_v53 = vpop.f32.mrb[91].mxu1  ;;  %v4225_v52 = vld [vmem:[%s5886_s3 + $0xd] ss:$0 sm:$0xff] }
 0xf28   : > { %v3390_v54 = vpop.f32.mrb[100].mxu0 }
 0xf29   : > { %v3489_v56 = vsel %vm429_vm1, %v3390_v54, 0.0  ;;  %v4748_v57 = vpop.f32.mrb[101].mxu0 }
 0xf2a   : > { %v3490_v58 = vadd.f32 %v3489_v56, %v3488_v55  ;;  %v3393_v59 = vpop.f32.mrb[102].mxu0 }
 0xf2b   : > { %v4749_v61 = vpop.f32.mrb[103].mxu0 }
 0xf2c   : > { %v3492_v62 = vadd.f32 %v3491_v60, %v3490_v58 }
 0xf30   : > { %v3482_v63 = vpop.f32.mrb[104].mxu0 }
 0xf31   : > { %v3493_v0 = vsel %vm429_vm1, %v3482_v63, 0.0  ;;  %v4760_v5 = vpop.f32.mrb[105].mxu0 }
 0xf32   : > { %v3494_v6 = vadd.f32 %v3493_v0, %v3492_v62  ;;  %v3485_v7 = vpop.f32.mrb[106].mxu0  ;;  %v4892_v0 = vld [vmem:[%s5893_s10 + $0x4] ss:$8 sps:$4 sm:$0xff]   ;;  %v4890_v5 = vld [vmem:[%s5893_s10] ss:$8 sps:$4 sm:$0xff]  }
 0xf33   : > { %v4761_v28 = vpop.f32.mrb[107].mxu0  ;;  %v4895_v7 = vld [vmem:[%s5893_s10 + $0x14] ss:$8 sps:$4 sm:$0xff]  }
 0xf34   : > { %v3495_v9 = vadd.f32 %v3494_v6, %v5460_v4  ;;  %v4881_v4 = vld [vmem:[%s5890_s7 + $0x18] sm:$0xff]   ;;  %v4975_v28 = vmov 0  }
 0xf35   : > { %4765 = vmatpush3.bf16.msra.mxu1 %v4881_v4  ;;  %v4893_v6 = vld [vmem:[%s5893_s10 + $0x10] ss:$8 sps:$4 sm:$0xff]  }
 0xf36   : > { %v5756_v11 = vadd.f32 %v4190_v8, %v3495_v9  ;;  %3765 = vmatprep.subr.bf16.mxu1 %v4892_v0 }
 0xf38   : > { %v3501_v12 = vsel %vm429_vm1, %v5756_v11, 0.0 }
 0xf39   : > { %3502 = vadd.xlane.f32.xlu0 %v3501_v12 }
 0xfc6   : > { %v3503_v13 = vpop.xlane.xlu0 %3502 }
 0xfc7   : > { %v3504_v14 = vmul.f32 0.03125, %v3503_v13  ;;  %v4226_v13 = vld [vmem:[%s5892_s9] ss:$0 sm:$0xff] }
 0xfc9   : > { %v3505_v15 = vsub.f32 %v5756_v11, %v3504_v14 }
 0xfcb   : > { %v3506_v17 = vmul.f32 %v3505_v15, %v3505_v15 }
 0xfcd   : > { %v3507_v18 = vsel %vm429_vm1, %v3506_v17, 0.0 }
 0xfce   : > { %3508 = vadd.xlane.f32.xlu1 %v3507_v18 }
0x105b   : > { %v3509_v2 = vpop.xlane.xlu1 %3508 }
0x105c   : > { %v3510_v1 = vmul.f32 0.03125, %v3509_v2  ;;  %v4897_v2 = vld [vmem:[%s5894_s11 + $0x8] sm:$0xff]  }
0x105e   : > { %v3511_v21 = vadd.f32 1e-05, %v3510_v1  ;;  %v4898_v1 = vld [vmem:[%s5894_s11 + $0x10] sm:$0xff]  }
0x1060   : > { %4944 = vrsqrt.f32 %v3511_v21  ;;  %v4899_v21 = vld [vmem:[%s5894_s11 + $0x18] sm:$0xff]  }
0x106a   : > { %v4945_v22 = vpop.eup %4944 }
0x106b   : > { %v3513_v23 = vmul.f32 %v4945_v22, %v3505_v15  ;;  %v4227_v15 = vld [vmem:[%s5892_s9 + $0x1] ss:$0 sm:$0xff] }
0x106c   : > { %v4900_v22 = vld [vmem:[%s5894_s11 + $0x20] sm:$0xff]  }
0x106d   : > { %v3518_v25 = vmul.f32 %v4191_v3, %v3513_v23  ;;  %v4901_v3 = vld [vmem:[%s5894_s11 + $0x28] sm:$0xff]   ;;  %v4902_v23 = vld [vmem:[%s5894_s11 + $0x30] sm:$0xff]  }
0x106f   : > { %v3523_v26 = vadd.f32 %v4192_v24, %v3518_v25  ;;  %v4903_v24 = vld [vmem:[%s5894_s11 + $0x38] sm:$0xff]   ;;  %v4233_v25 = vld [vmem:[%s5892_s9 + $0x2] ss:$0 sm:$0xff] }
0x1071   : > { %v3524_v10 = vpack.c.bf16 %v3523_v26, %v3523_v26 }
0x1073   : > { %4767 = vmatmul.mubr.msk.bf16.vlgmr.msra.gmra.mrb[92].mxu1 %vm429_vm1, %v3524_v10 }
0x1074   : > { %3766 = vmatpush1.bf16.msra.mxu1 %v4890_v5  ;;  %3797 = vmatprep.mubr.bf16.mxu1 %v4975_v28 }
0x1075   : > { %3767 = vmatprep.subr.bf16.mxu1 %v4895_v7 }
0x1078   : > { %3768 = vmatpush1.bf16.msra.mxu1 %v4893_v6 }
0x1079   : > { %4790 = vmatprep.subr.bf16.mxu1 %v4973_v19 }
0x1146   : > { %v3583_v37 = vpop.f32.mrb[92].mxu1 }
0x1147   : > { %v3584_v38 = vadd.f32 %v4197_v36, %v3583_v37  ;;  %v4768_v39 = vpop.f32.mrb[93].mxu1 }
0x1148   : > { %v3586_v40 = vpop.f32.mrb[94].mxu1 }
0x1149   : > { %v3589_v41 = vmul.f32 %v3584_v38, %v3584_v38  ;;  %v4769_v42 = vpop.f32.mrb[95].mxu1 }
0x114b   : > { %v3590_v43 = vmul.f32 %v3589_v41, %v3584_v38 }
0x114d   : > { %v3591_v44 = vmul.f32 0.044715, %v3590_v43 }
0x114f   : > { %v3592_v45 = vadd.f32 %v3591_v44, %v3584_v38 }
0x1151   : > { %v3593_v46 = vmul.f32 0.7978846, %v3592_v45 }
0x1153   : > { %4946 = vtanh.f32 %v3593_v46 }
0x115d   : > { %v4947_v16 = vpop.eup %4946 }
0x115e   : > { %v3595_v47 = vadd.f32 1.0, %v4947_v16 }
0x1160   : > { %v3596_v48 = vmul.f32 0.5, %v3595_v47 }
0x1162   : > { %v3597_v49 = vmul.f32 %v3596_v48, %v3584_v38 }
0x1164   : > { %v3598_v50 = vpack.c.bf16 %v3597_v49, %v3597_v49 }
0x1166   : > { %4787 = vmatmul.mubr.bf16.vlgmr.msra.gmra.mrb[108].mxu0 %v3598_v50 }
0x1239   : > { %v3698_v51 = vpop.f32.mrb[108].mxu0 }
0x123a   : > { %v3704_v53 = vadd.f32 %v3698_v51, %v5756_v11  ;;  %v4788_v54 = vpop.f32.mrb[109].mxu0 }
0x123b   : > { %v3701_v55 = vpop.f32.mrb[110].mxu0 }
0x123c   : > { %v4789_v56 = vpop.f32.mrb[111].mxu0  ;;  %v3709_v57 = vadd.f32 %v4225_v52, %v3704_v53 }
0x123e   : > { %v3714_v58 = vsel %vm429_vm1, %v3709_v57, 0.0 }
0x123f   : > { %3715 = vadd.xlane.f32.xlu0 %v3714_v58 }
0x12cc   : > { %v3716_v59 = vpop.xlane.xlu0 %3715 }
0x12cd   : > { %v3717_v60 = vmul.f32 0.03125, %v3716_v59 }
0x12cf   : > { %v3718_v61 = vsub.f32 %v3709_v57, %v3717_v60 }
0x12d1   : > { %v3719_v62 = vmul.f32 %v3718_v61, %v3718_v61 }
0x12d3   : > { %v3720_v63 = vsel %vm429_vm1, %v3719_v62, 0.0 }
0x12d4   : > { %3721 = vadd.xlane.f32.xlu1 %v3720_v63 }
0x1361   : > { %v3722_v8 = vpop.xlane.xlu1 %3721 }
0x1362   : > { %v3723_v9 = vmul.f32 0.03125, %v3722_v8 }
0x1364   : > { %v3724_v11 = vadd.f32 1e-05, %v3723_v9 }
0x1366   : > { %4948 = vrsqrt.f32 %v3724_v11 }
0x1370   : > { %v4949_v12 = vpop.eup %4948 }
0x1371   : > { %v3726_v14 = vmul.f32 %v4949_v12, %v3718_v61 }
0x1373   : > { %v3731_v17 = vmul.f32 %v4226_v13, %v3726_v14 }
0x1375   : > { %v3736_v18 = vadd.f32 %v4227_v15, %v3731_v17 }
0x1377   : > { %v3737_v4 = vpack.c.bf16 %v3736_v18, %v3736_v18 }
0x1379   : > { %4232 = vmatmul.mubr.msk.bf16.vlgmr.msra.gmra.mrb[96].mxu1 %vm429_vm1, %v3737_v4 }
0x137a   : > { %4791 = vmatpush3.bf16.msra.mxu1 %v4896_v20  ;;  %4806 = vmatprep.mubr.msk.bf16.mxu1 %vm4974_vm2, %v4973_v19 }
0x137b   : > { %4792 = vmatprep.subr.bf16.mxu1 %v4973_v19 }
0x137e   : > { %4793 = vmatpush3.bf16.msra.mxu1 %v4897_v2 }
0x137f   : > { %4794 = vmatprep.subr.bf16.mxu1 %v4973_v19 }
0x1382   : > { %4795 = vmatpush3.bf16.msra.mxu1 %v4898_v1 }
0x1383   : > { %4796 = vmatprep.subr.bf16.mxu1 %v4973_v19 }
0x1386   : > { %4797 = vmatpush3.bf16.msra.mxu1 %v4899_v21 }
0x1387   : > { %4798 = vmatprep.subr.bf16.mxu1 %v4973_v19 }
0x138a   : > { %4799 = vmatpush3.bf16.msra.mxu1 %v4900_v22 }
0x138b   : > { %4800 = vmatprep.subr.bf16.mxu1 %v4973_v19 }
0x138e   : > { %4801 = vmatpush3.bf16.msra.mxu1 %v4901_v3 }
0x138f   : > { %4802 = vmatprep.subr.bf16.mxu1 %v4973_v19 }
0x1392   : > { %4803 = vmatpush3.bf16.msra.mxu1 %v4902_v23 }
0x1393   : > { %4804 = vmatprep.subr.bf16.mxu1 %v4973_v19  ;;  %v4242_v19 = vld [vmem:[%s5892_s9 + $0x3] ss:$0 sm:$0xff] }
0x1396   : > { %4805 = vmatpush3.bf16.msra.mxu1 %v4903_v24 }
0x144c   : > { %v3799_v26 = vpop.f32.mrb[96].mxu1 }
0x144d   : > { %v3801_v10 = vpop.f32.mrb[97].mxu1 }
0x144e   : > { %v3810_v27 = vadd.f32 %v4233_v25, %v3801_v10  ;;  %v3803_v29 = vpop.f32.mrb[98].mxu1 }
0x144f   : > { %v3804_v30 = vpop.f32.mrb[99].mxu1 }
0x1450   : > { %v3811_v31 = vmax.f32 %v3810_v27, 0.0 }
0x1452   : > { %v3812_v32 = vpack.c.bf16 %v3811_v31, %v3811_v31 }
0x1454   : > { %4807 = vmatmul.mubr.bf16.vlgmr.msra.gmra.mrb[100].mxu1 %v3812_v32 }
0x1527   : > { %v3911_v33 = vpop.f32.mrb[100].mxu1 }
0x1528   : > { %v3917_v34 = vadd.f32 %v3911_v33, %v3799_v26  ;;  %v4808_v35 = vpop.f32.mrb[101].mxu1 }
0x1529   : > { %v3914_v36 = vpop.f32.mrb[102].mxu1 }
0x152a   : > { %v3922_v37 = vadd.f32 %v4242_v19, %v3917_v34  ;;  %v4809_v38 = vpop.f32.mrb[103].mxu1 }
0x152c   : > { %3923 = vst [vmem:[%s371_s21] sm:$0xff] %v3922_v37 }
0x152d PF: > { %s5906_s12 = sld [smem:[#allocation6_spill]] }
0x1533   : > { %s28_s26 = sadd.s32 1, %s5906_s12  }
0x1534   : > { %p25_p9 = scmp.ge.s32.totalorder %s28_s26, 4  }
0x1536   :  { %27 = sbr.rel (!%p25_p9) target bundleno = 16 (0x10), region = 105 }

</bundles_post_ra>
